<compile_context>
chip_gen: v7x
topology: tpu7x:2x2x1
jax: 0.10.0
libtpu: 0.0.40
codegen_flags: <defaults>
</compile_context>

<pallas_src>
import math

import jax
import jax.numpy as jnp
from jax.experimental import pallas as pl
from jax.experimental.pallas import tpu as pltpu

NEG_SLOPE = 0.2
_NEG_BIG = -1e30     # finite "-inf" for masking: exp(-1e30 - m) == 0, no inf arithmetic
_SUB = 8             # f32 sublane tile
_LANE = 128          # lane width


def _round_up(x, m):
    return (x + m - 1) // m * m


def _leaky_relu(x):
    return jnp.where(x >= 0, x, NEG_SLOPE * x)


def gatedge_kernel(adj_ref, proc_ref, el_ref, er_ref, fsrc_ref, fdst_ref,
                   wedge_ref, weal_ref, out_ref):
    """One grid step processes bt batches, carried on the 128-wide lane axis.

    Block layouts (batch == minor/lane axis everywhere):
      adj_ref, proc_ref : (n_opes_p, n_mas_p, bt)
      el_ref            : (n_opes_p, bt)          el[i,b] = <feat_src[b,i,:], attn_l>
      er_ref            : (n_mas_p,  bt)          er[j,b] = <feat_dst[b,j,:], attn_r>
      fsrc_ref          : (n_opes_p, out_p, bt)   feat_src
      fdst_ref          : (n_mas_p,  out_p, bt)   feat_dst
      wedge_ref         : (out_p, 1)              W_edge as a column (VMEM)
      weal_ref          : (1, 1)                  <W_edge, attn_l>  (SMEM scalar)
      out_ref           : (n_mas_p * out_p, bt)   lane-dense store
    """
    n_opes_p, n_mas_p, bt = adj_ref.shape
    out_p = fsrc_ref.shape[1]

    adj = adj_ref[...]                       # 0/1 mask, f32
    proc = proc_ref[...]
    el = el_ref[...]                         # (n_opes_p, bt)
    er = er_ref[...]                         # (n_mas_p, bt)
    we_dot_al = weal_ref[0, 0]               # scalar from SMEM

    # ---- attention logits, factored: adj * (el + er) + proc * <W_edge, attn_l> ----
    el3 = el[:, None, :]                     # (n_opes_p, 1, bt) -> broadcasts over machines
    er3 = er[None, :, :]                     # (1, n_mas_p, bt)  -> broadcasts over operations
    eijk = _leaky_relu(adj * (el3 + er3) + proc * we_dot_al)    # (n_opes_p, n_mas_p, bt)
    ekk = _leaky_relu(2.0 * er)                                  # self-loop logit (n_mas_p, bt)

    # ---- masked softmax over operations + self loop (reduce over the leading axis) ----
    e_msk = jnp.where(adj > 0.5, eijk, _NEG_BIG)
    m = jnp.maximum(jnp.max(e_msk, axis=0), ekk)                 # (n_mas_p, bt), always finite
    p = jnp.exp(e_msk - m[None, :, :])                           # masked entries underflow to 0
    p_kk = jnp.exp(ekk - m)                                      # (n_mas_p, bt)
    inv_denom = pl.reciprocal(jnp.sum(p, axis=0) + p_kk)         # exact recip (tiny tensor)

    # ---- aggregation, common denominator applied once at the end ----
    # z[j,d,b] = ( (sum_i proc*p)[j,b]*W_edge[d] + feat_dst[j,d,b]*p_kk[j,b]
    #              + sum_i p[i,j,b]*feat_src[i,d,b] ) * inv_denom[j,b]
    s = jnp.sum(proc * p, axis=0)                                # (n_mas_p, bt)
    acc = s[:, None, :] * wedge_ref[...][None, :, :]             # edge term (n_mas_p, out_p, bt)
    acc = acc + fdst_ref[...] * p_kk[:, None, :]                 # self-loop term
    fsrc = fsrc_ref[...]                                         # (n_opes_p, out_p, bt)
    for i in range(n_opes_p):                                    # unrolled full-width VPU MACs
        acc = acc + p[i][:, None, :] * fsrc[i][None, :, :]
    z = acc * inv_denom[:, None, :]

    sig = pl.reciprocal(1.0 + jnp.exp(-z), approx=True)          # sigmoid via EUP
    # (n_mas_p, out_p, bt) -> (n_mas_p*out_p, bt): tile-aligned no-op reshape, 128-lane store
    out_ref[...] = sig.reshape(n_mas_p * out_p, bt)


def gatedge_forward(adj_all, batch_idxes, h_src, h_dst, proc, params, *, block_b=256):
    """adj_all: (total_B, n_opes, n_mas) int; h_src: (B, n_opes, in_src);
    h_dst: (B, n_mas, in_dst); proc: (B, n_opes, n_mas).  Returns (B, n_mas, out_feats)."""
    W_src, W_dst, W_edge, attn_l, attn_r = params
    f32 = jnp.float32

    B = batch_idxes.shape[0]
    n_opes = h_src.shape[1]
    n_mas = h_dst.shape[1]
    out_feats = W_src.shape[1]

    h_src = h_src.astype(f32)
    h_dst = h_dst.astype(f32)
    proc = proc.astype(f32)
    W_src = W_src.astype(f32)
    W_dst = W_dst.astype(f32)
    W_edge = W_edge.astype(f32)
    attn_l = attn_l.astype(f32)
    attn_r = attn_r.astype(f32)

    # ---- grid-invariant work hoisted to XLA (tiny K=in_src/in_dst matmuls + dot products) ----
    feat_src = h_src @ W_src                                        # (B, n_opes, out)
    feat_dst = h_dst @ W_dst                                        # (B, n_mas, out)
    v_l = W_src @ attn_l.reshape(-1, 1)                             # (in_src, 1)
    el = (h_src @ v_l)[..., 0]                                      # (B, n_opes)
    er = jnp.sum(feat_dst * attn_r.reshape(1, 1, -1), axis=-1)      # (B, n_mas)
    we_dot_al = jnp.sum(W_edge * attn_l).reshape(1, 1)              # scalar -> SMEM input
    adj = adj_all[batch_idxes].astype(f32)                          # gather + single cast

    # ---- padding: node/feature dims to sublane multiples, batch to lane multiples ----
    n_opes_p = _round_up(n_opes, _SUB)
    n_mas_p = _round_up(n_mas, _SUB)
    out_p = _round_up(out_feats, _SUB)

    n_groups = -(-B // _LANE)                        # 128-wide lane groups covering the batch
    gps = max(1, min(block_b // _LANE, n_groups))    # lane groups per grid step
    if n_groups >= 2 and gps >= n_groups:
        gps = -(-n_groups // 2)                      # keep >= 2 grid steps (dual-TC on v7x)
    bt = gps * _LANE
    b_pad = _round_up(B, bt)

    def pad3(x, d1, d2):
        return jnp.pad(x, ((0, b_pad - x.shape[0]),
                           (0, d1 - x.shape[1]),
                           (0, d2 - x.shape[2])))

    def pad2(x, d1):
        return jnp.pad(x, ((0, b_pad - x.shape[0]), (0, d1 - x.shape[1])))

    # batch-on-lanes layouts: batch is the minor axis of every kernel operand (layout plumbing)
    adjL = jnp.transpose(pad3(adj, n_opes_p, n_mas_p), (1, 2, 0))
    procL = jnp.transpose(pad3(proc, n_opes_p, n_mas_p), (1, 2, 0))
    fsrcL = jnp.transpose(pad3(feat_src, n_opes_p, out_p), (1, 2, 0))
    fdstL = jnp.transpose(pad3(feat_dst, n_mas_p, out_p), (1, 2, 0))
    elL = jnp.transpose(pad2(el, n_opes_p), (1, 0))
    erL = jnp.transpose(pad2(er, n_mas_p), (1, 0))
    wedge_col = jnp.pad(W_edge.reshape(out_feats, 1), ((0, out_p - out_feats), (0, 0)))

    # per-step VMEM footprint (f32) -> scoped-VMEM limit (keep headroom for v7x's 64 MiB/TC)
    per_step = 4 * bt * (2 * n_opes_p * n_mas_p + (n_opes_p + n_mas_p) * out_p
                         + n_opes_p + n_mas_p + n_mas_p * out_p)
    vmem_limit = int(min(48 * 2**20, max(16 * 2**20, 8 * per_step)))

    grid = (b_pad // bt,)
    grid_spec = pltpu.PrefetchScalarGridSpec(
        num_scalar_prefetch=0,
        grid=grid,
        in_specs=[
            pl.BlockSpec((n_opes_p, n_mas_p, bt), lambda g: (0, 0, g)),   # adj
            pl.BlockSpec((n_opes_p, n_mas_p, bt), lambda g: (0, 0, g)),   # proc
            pl.BlockSpec((n_opes_p, bt), lambda g: (0, g)),               # el
            pl.BlockSpec((n_mas_p, bt), lambda g: (0, g)),                # er
            pl.BlockSpec((n_opes_p, out_p, bt), lambda g: (0, 0, g)),     # feat_src
            pl.BlockSpec((n_mas_p, out_p, bt), lambda g: (0, 0, g)),      # feat_dst
            pl.BlockSpec((out_p, 1), lambda g: (0, 0)),                   # W_edge column
            pl.BlockSpec(memory_space=pltpu.MemorySpace.SMEM),            # <W_edge, attn_l>
        ],
        out_specs=pl.BlockSpec((n_mas_p * out_p, bt), lambda g: (0, g)),
    )

    out2d = pl.pallas_call(
        gatedge_kernel,
        grid_spec=grid_spec,
        out_shape=jax.ShapeDtypeStruct((n_mas_p * out_p, b_pad), f32),
        compiler_params=pltpu.CompilerParams(
            dimension_semantics=("parallel",),      # independent batch blocks
            vmem_limit_bytes=vmem_limit,
        ),
    )(adjL, procL, elL, erL, fsrcL, fdstL, wedge_col, we_dot_al)

    # (n_mas_p*out_p, b_pad) -> (B, n_mas, out): single wrapper-side transpose (layout plumbing)
    out = out2d.reshape(n_mas_p, out_p, b_pad)
    return jnp.transpose(out, (2, 0, 1))[:B, :n_mas, :out_feats]


def gatedge_reference(adj_all, batch_idxes, h_src, h_dst, proc, params):
    """Pure-JAX mirror of the PyTorch forward (for verification)."""
    W_src, W_dst, W_edge, attn_l, attn_r = params
    feat_src = h_src @ W_src                                   # (B, n_opes, out)
    feat_dst = h_dst @ W_dst                                   # (B, n_mas, out)
    feat_edge = proc[..., None] * W_edge[0]                    # (B, n_opes, n_mas, out)
    al = attn_l.reshape(1, 1, -1)
    ar = attn_r.reshape(1, 1, -1)
    el = jnp.sum(feat_src * al, -1, keepdims=True)             # (B, n_opes, 1)
    er = jnp.sum(feat_dst * ar, -1, keepdims=True)             # (B, n_mas, 1)
    ee = jnp.sum(feat_edge * al, -1, keepdims=True)            # (B, n_opes, n_mas, 1)
    adj = adj_all[batch_idxes].astype(jnp.float32)             # (B, n_opes, n_mas)
    adj_e = adj[..., None]
    lrelu = lambda x: jnp.where(x > 0, x, NEG_SLOPE * x)
    a = adj_e * el[:, :, None, :] + ee + adj_e * er[:, None, :, :]
    eijk = lrelu(a)
    ekk = lrelu(er + er)                                       # (B, n_mas, 1)
    mask = jnp.concatenate(
        [adj_e == 1, jnp.ones((adj.shape[0], 1, adj.shape[2], 1), bool)], axis=-3)
    e = jnp.concatenate([eijk, ekk[:, None, :, :]], axis=-3)   # (B, n_opes+1, n_mas, 1)
    e = jnp.where(mask, e, -jnp.inf)
    alpha = jax.nn.softmax(jnp.squeeze(e, -1), axis=-2)        # (B, n_opes+1, n_mas)
    alpha_ijk = alpha[:, :-1, :]
    alpha_kk = alpha[:, -1:, :]                                # (B, 1, n_mas)
    Wmu = feat_edge + feat_src[:, :, None, :]
    b = jnp.sum(Wmu * alpha_ijk[..., None], axis=-3)           # (B, n_mas, out)
    c = feat_dst * jnp.squeeze(alpha_kk, 1)[..., None]
    return jax.nn.sigmoid(b + c)


if __name__ == "__main__":
    key = jax.random.PRNGKey(0)
    num_head = 1
    in_feats = (6, 3)          # (operation node dim, machine node dim)
    out_feats = 8
    total_B, B = 3, 2
    n_opes, n_mas = 8, 4

    ks = jax.random.split(key, 10)
    gain = math.sqrt(2.0)      # nn.init.calculate_gain('relu')

    def xavier(k, shape, fan_in, fan_out):
        std = gain * math.sqrt(2.0 / (fan_in + fan_out))
        return (std * jax.random.normal(k, shape)).astype(jnp.float32)

    W_src = xavier(ks[0], (in_feats[0], out_feats * num_head), in_feats[0], out_feats * num_head)
    W_dst = xavier(ks[1], (in_feats[1], out_feats * num_head), in_feats[1], out_feats * num_head)
    W_edge = xavier(ks[2], (1, out_feats * num_head), 1, out_feats * num_head)
    attn_l = xavier(ks[3], (1, out_feats), num_head * out_feats, out_feats)
    attn_r = xavier(ks[4], (1, out_feats), num_head * out_feats, out_feats)
    attn_e = xavier(ks[5], (1, out_feats), num_head * out_feats, out_feats)  # unused by forward

    adj_all = jax.random.bernoulli(ks[6], 0.6, (total_B, n_opes, n_mas)).astype(jnp.int32)
    h_src = jax.random.normal(ks[7], (B, n_opes, in_feats[0]), jnp.float32)   # feat[0]
    h_dst = jax.random.normal(ks[8], (B, n_mas, in_feats[1]), jnp.float32)    # feat[1]
    proc = jax.random.uniform(ks[9], (B, n_opes, n_mas), jnp.float32)         # feat[2]
    batch_idxes = jnp.array([0, 2], jnp.int32)

    params = (W_src, W_dst, W_edge, attn_l, attn_r)

    out = gatedge_forward(adj_all, batch_idxes, h_src, h_dst, proc, params)
    out = jax.block_until_ready(out)

    ref = gatedge_reference(adj_all, batch_idxes, h_src, h_dst, proc, params)
    assert out.shape == (B, n_mas, out_feats)
    # tolerance covers the EUP approx sigmoid reciprocal + fp reassociation of hoisted el
    assert jnp.allclose(out, ref, atol=5e-3, rtol=5e-3), (out, ref)
    print("KERNEL_OK")
</pallas_src>

<mosaic_0001>
module attributes {stable_mosaic.version = 11 : i64} {
  func.func @gatedge_kernel(%arg0: i32, %arg1: memref<8x8x128xf32, #tpu.memory_space<vmem>>, %arg2: memref<8x8x128xf32, #tpu.memory_space<vmem>>, %arg3: memref<8x128xf32, #tpu.memory_space<vmem>>, %arg4: memref<8x128xf32, #tpu.memory_space<vmem>>, %arg5: memref<8x8x128xf32, #tpu.memory_space<vmem>>, %arg6: memref<8x8x128xf32, #tpu.memory_space<vmem>>, %arg7: memref<8x1xf32, #tpu.memory_space<vmem>>, %arg8: memref<1x1xf32, #tpu.memory_space<smem>>, %arg9: memref<64x128xf32, #tpu.memory_space<vmem>>) attributes {dimension_semantics = [#tpu.dimension_semantics<parallel>], iteration_bounds = array<i64: 1>, scalar_prefetch = 0 : i64, scratch_operands = 0 : i64, tpu.core_type = #tpu.core_type<tc>, window_params = [{transform_indices = @transform_0, window_bounds = array<i64: 8, 8, 128>}, {transform_indices = @transform_1, window_bounds = array<i64: 8, 8, 128>}, {transform_indices = @transform_2, window_bounds = array<i64: 8, 128>}, {transform_indices = @transform_3, window_bounds = array<i64: 8, 128>}, {transform_indices = @transform_4, window_bounds = array<i64: 8, 8, 128>}, {transform_indices = @transform_5, window_bounds = array<i64: 8, 8, 128>}, {pipeline_mode = #tpu.pipeline_mode<synchronous>, transform_indices = @transform_6, window_bounds = array<i64: 8, 1>}, {transform_indices = @transform_7, window_bounds = array<i64: 1, 1>}, {transform_indices = @transform_8, window_bounds = array<i64: 64, 128>}]} {
    %c0 = arith.constant 0 : index
    %c0_0 = arith.constant 0 : index
    %c0_1 = arith.constant 0 : index
    %0 = vector.load %arg1[%c0, %c0_0, %c0_1] : memref<8x8x128xf32, #tpu.memory_space<vmem>>, vector<8x8x128xf32>
    %c0_2 = arith.constant 0 : index
    %c0_3 = arith.constant 0 : index
    %c0_4 = arith.constant 0 : index
    %1 = vector.load %arg2[%c0_2, %c0_3, %c0_4] : memref<8x8x128xf32, #tpu.memory_space<vmem>>, vector<8x8x128xf32>
    %c0_5 = arith.constant 0 : index
    %c0_6 = arith.constant 0 : index
    %2 = vector.load %arg3[%c0_5, %c0_6] : memref<8x128xf32, #tpu.memory_space<vmem>>, vector<8x128xf32>
    %c0_7 = arith.constant 0 : index
    %c0_8 = arith.constant 0 : index
    %3 = vector.load %arg4[%c0_7, %c0_8] : memref<8x128xf32, #tpu.memory_space<vmem>>, vector<8x128xf32>
    %c0_9 = arith.constant 0 : index
    %c0_10 = arith.constant 0 : index
    %4 = memref.load %arg8[%c0_9, %c0_10] : memref<1x1xf32, #tpu.memory_space<smem>>
    %5 = vector.shape_cast %2 : vector<8x128xf32> to vector<8x1x128xf32>
    %6 = vector.shape_cast %3 : vector<8x128xf32> to vector<1x8x128xf32>
    %7 = vector.broadcast %5 : vector<8x1x128xf32> to vector<8x8x128xf32>
    %8 = vector.broadcast %6 : vector<1x8x128xf32> to vector<8x8x128xf32>
    %9 = arith.addf %7, %8 : vector<8x8x128xf32>
    %10 = arith.mulf %0, %9 : vector<8x8x128xf32>
    %11 = vector.broadcast %4 : f32 to vector<8x8x128xf32>
    %12 = arith.mulf %1, %11 : vector<8x8x128xf32>
    %13 = arith.addf %10, %12 : vector<8x8x128xf32>
    %cst = arith.constant 0.000000e+00 : f32
    %14 = vector.broadcast %cst : f32 to vector<8x8x128xf32>
    %15 = arith.cmpf oge, %13, %14 : vector<8x8x128xf32>
    %cst_11 = arith.constant 2.000000e-01 : f32
    %16 = vector.broadcast %cst_11 : f32 to vector<8x8x128xf32>
    %17 = arith.mulf %16, %13 : vector<8x8x128xf32>
    %18 = arith.select %15, %13, %17 : vector<8x8x128xi1>, vector<8x8x128xf32>
    %cst_12 = arith.constant 2.000000e+00 : f32
    %19 = vector.broadcast %cst_12 : f32 to vector<8x128xf32>
    %20 = arith.mulf %19, %3 : vector<8x128xf32>
    %cst_13 = arith.constant 0.000000e+00 : f32
    %21 = vector.broadcast %cst_13 : f32 to vector<8x128xf32>
    %22 = arith.cmpf oge, %20, %21 : vector<8x128xf32>
    %cst_14 = arith.constant 2.000000e-01 : f32
    %23 = vector.broadcast %cst_14 : f32 to vector<8x128xf32>
    %24 = arith.mulf %23, %20 : vector<8x128xf32>
    %25 = arith.select %22, %20, %24 : vector<8x128xi1>, vector<8x128xf32>
    %cst_15 = arith.constant 5.000000e-01 : f32
    %26 = vector.broadcast %cst_15 : f32 to vector<8x8x128xf32>
    %27 = arith.cmpf ogt, %0, %26 : vector<8x8x128xf32>
    %cst_16 = arith.constant -1.000000e+30 : f32
    %28 = vector.broadcast %cst_16 : f32 to vector<8x8x128xf32>
    %29 = arith.select %27, %18, %28 : vector<8x8x128xi1>, vector<8x8x128xf32>
    %cst_17 = arith.constant dense<0xFF800000> : vector<8x128xf32>
    %30 = vector.multi_reduction <maximumf>, %29, %cst_17 [0] : vector<8x8x128xf32> to vector<8x128xf32>
    %31 = arith.maximumf %30, %25 : vector<8x128xf32>
    %32 = vector.shape_cast %31 : vector<8x128xf32> to vector<1x8x128xf32>
    %33 = vector.broadcast %32 : vector<1x8x128xf32> to vector<8x8x128xf32>
    %34 = arith.subf %29, %33 : vector<8x8x128xf32>
    %35 = math.exp %34 : vector<8x8x128xf32>
    %36 = arith.subf %25, %31 : vector<8x128xf32>
    %37 = math.exp %36 : vector<8x128xf32>
    %cst_18 = arith.constant dense<0.000000e+00> : vector<8x128xf32>
    %38 = vector.multi_reduction <add>, %35, %cst_18 [0] : vector<8x8x128xf32> to vector<8x128xf32>
    %39 = arith.addf %38, %37 : vector<8x128xf32>
    %40 = tpu.reciprocal %39 : vector<8x128xf32> -> vector<8x128xf32>
    %41 = arith.mulf %1, %35 : vector<8x8x128xf32>
    %cst_19 = arith.constant dense<0.000000e+00> : vector<8x128xf32>
    %42 = vector.multi_reduction <add>, %41, %cst_19 [0] : vector<8x8x128xf32> to vector<8x128xf32>
    %43 = vector.shape_cast %42 : vector<8x128xf32> to vector<8x1x128xf32>
    %c0_20 = arith.constant 0 : index
    %c0_21 = arith.constant 0 : index
    %44 = vector.load %arg7[%c0_20, %c0_21] : memref<8x1xf32, #tpu.memory_space<vmem>>, vector<8x1xf32>
    %45 = vector.shape_cast %44 : vector<8x1xf32> to vector<1x8x1xf32>
    %46 = vector.broadcast %43 : vector<8x1x128xf32> to vector<8x8x128xf32>
    %47 = vector.broadcast %45 : vector<1x8x1xf32> to vector<8x8x128xf32>
    %48 = arith.mulf %46, %47 : vector<8x8x128xf32>
    %c0_22 = arith.constant 0 : index
    %c0_23 = arith.constant 0 : index
    %c0_24 = arith.constant 0 : index
    %49 = vector.load %arg6[%c0_22, %c0_23, %c0_24] : memref<8x8x128xf32, #tpu.memory_space<vmem>>, vector<8x8x128xf32>
    %50 = vector.shape_cast %37 : vector<8x128xf32> to vector<8x1x128xf32>
    %51 = vector.broadcast %50 : vector<8x1x128xf32> to vector<8x8x128xf32>
    %52 = arith.mulf %49, %51 : vector<8x8x128xf32>
    %53 = arith.addf %48, %52 : vector<8x8x128xf32>
    %c0_25 = arith.constant 0 : index
    %c0_26 = arith.constant 0 : index
    %c0_27 = arith.constant 0 : index
    %54 = vector.load %arg5[%c0_25, %c0_26, %c0_27] : memref<8x8x128xf32, #tpu.memory_space<vmem>>, vector<8x8x128xf32>
    %55 = vector.extract_strided_slice %35 {offsets = [0, 0, 0], sizes = [1, 8, 128], strides = [1, 1, 1]} : vector<8x8x128xf32> to vector<1x8x128xf32>
    %56 = vector.shape_cast %55 : vector<1x8x128xf32> to vector<8x128xf32>
    %57 = vector.shape_cast %56 : vector<8x128xf32> to vector<8x1x128xf32>
    %58 = vector.extract_strided_slice %54 {offsets = [0, 0, 0], sizes = [1, 8, 128], strides = [1, 1, 1]} : vector<8x8x128xf32> to vector<1x8x128xf32>
    %59 = vector.shape_cast %58 : vector<1x8x128xf32> to vector<8x128xf32>
    %60 = vector.shape_cast %59 : vector<8x128xf32> to vector<1x8x128xf32>
    %61 = vector.broadcast %57 : vector<8x1x128xf32> to vector<8x8x128xf32>
    %62 = vector.broadcast %60 : vector<1x8x128xf32> to vector<8x8x128xf32>
    %63 = arith.mulf %61, %62 : vector<8x8x128xf32>
    %64 = arith.addf %53, %63 : vector<8x8x128xf32>
    %65 = vector.extract_strided_slice %35 {offsets = [1, 0, 0], sizes = [1, 8, 128], strides = [1, 1, 1]} : vector<8x8x128xf32> to vector<1x8x128xf32>
    %66 = vector.shape_cast %65 : vector<1x8x128xf32> to vector<8x128xf32>
    %67 = vector.shape_cast %66 : vector<8x128xf32> to vector<8x1x128xf32>
    %68 = vector.extract_strided_slice %54 {offsets = [1, 0, 0], sizes = [1, 8, 128], strides = [1, 1, 1]} : vector<8x8x128xf32> to vector<1x8x128xf32>
    %69 = vector.shape_cast %68 : vector<1x8x128xf32> to vector<8x128xf32>
    %70 = vector.shape_cast %69 : vector<8x128xf32> to vector<1x8x128xf32>
    %71 = vector.broadcast %67 : vector<8x1x128xf32> to vector<8x8x128xf32>
    %72 = vector.broadcast %70 : vector<1x8x128xf32> to vector<8x8x128xf32>
    %73 = arith.mulf %71, %72 : vector<8x8x128xf32>
    %74 = arith.addf %64, %73 : vector<8x8x128xf32>
    %75 = vector.extract_strided_slice %35 {offsets = [2, 0, 0], sizes = [1, 8, 128], strides = [1, 1, 1]} : vector<8x8x128xf32> to vector<1x8x128xf32>
    %76 = vector.shape_cast %75 : vector<1x8x128xf32> to vector<8x128xf32>
    %77 = vector.shape_cast %76 : vector<8x128xf32> to vector<8x1x128xf32>
    %78 = vector.extract_strided_slice %54 {offsets = [2, 0, 0], sizes = [1, 8, 128], strides = [1, 1, 1]} : vector<8x8x128xf32> to vector<1x8x128xf32>
    %79 = vector.shape_cast %78 : vector<1x8x128xf32> to vector<8x128xf32>
    %80 = vector.shape_cast %79 : vector<8x128xf32> to vector<1x8x128xf32>
    %81 = vector.broadcast %77 : vector<8x1x128xf32> to vector<8x8x128xf32>
    %82 = vector.broadcast %80 : vector<1x8x128xf32> to vector<8x8x128xf32>
    %83 = arith.mulf %81, %82 : vector<8x8x128xf32>
    %84 = arith.addf %74, %83 : vector<8x8x128xf32>
    %85 = vector.extract_strided_slice %35 {offsets = [3, 0, 0], sizes = [1, 8, 128], strides = [1, 1, 1]} : vector<8x8x128xf32> to vector<1x8x128xf32>
    %86 = vector.shape_cast %85 : vector<1x8x128xf32> to vector<8x128xf32>
    %87 = vector.shape_cast %86 : vector<8x128xf32> to vector<8x1x128xf32>
    %88 = vector.extract_strided_slice %54 {offsets = [3, 0, 0], sizes = [1, 8, 128], strides = [1, 1, 1]} : vector<8x8x128xf32> to vector<1x8x128xf32>
    %89 = vector.shape_cast %88 : vector<1x8x128xf32> to vector<8x128xf32>
    %90 = vector.shape_cast %89 : vector<8x128xf32> to vector<1x8x128xf32>
    %91 = vector.broadcast %87 : vector<8x1x128xf32> to vector<8x8x128xf32>
    %92 = vector.broadcast %90 : vector<1x8x128xf32> to vector<8x8x128xf32>
    %93 = arith.mulf %91, %92 : vector<8x8x128xf32>
    %94 = arith.addf %84, %93 : vector<8x8x128xf32>
    %95 = vector.extract_strided_slice %35 {offsets = [4, 0, 0], sizes = [1, 8, 128], strides = [1, 1, 1]} : vector<8x8x128xf32> to vector<1x8x128xf32>
    %96 = vector.shape_cast %95 : vector<1x8x128xf32> to vector<8x128xf32>
    %97 = vector.shape_cast %96 : vector<8x128xf32> to vector<8x1x128xf32>
    %98 = vector.extract_strided_slice %54 {offsets = [4, 0, 0], sizes = [1, 8, 128], strides = [1, 1, 1]} : vector<8x8x128xf32> to vector<1x8x128xf32>
    %99 = vector.shape_cast %98 : vector<1x8x128xf32> to vector<8x128xf32>
    %100 = vector.shape_cast %99 : vector<8x128xf32> to vector<1x8x128xf32>
    %101 = vector.broadcast %97 : vector<8x1x128xf32> to vector<8x8x128xf32>
    %102 = vector.broadcast %100 : vector<1x8x128xf32> to vector<8x8x128xf32>
    %103 = arith.mulf %101, %102 : vector<8x8x128xf32>
    %104 = arith.addf %94, %103 : vector<8x8x128xf32>
    %105 = vector.extract_strided_slice %35 {offsets = [5, 0, 0], sizes = [1, 8, 128], strides = [1, 1, 1]} : vector<8x8x128xf32> to vector<1x8x128xf32>
    %106 = vector.shape_cast %105 : vector<1x8x128xf32> to vector<8x128xf32>
    %107 = vector.shape_cast %106 : vector<8x128xf32> to vector<8x1x128xf32>
    %108 = vector.extract_strided_slice %54 {offsets = [5, 0, 0], sizes = [1, 8, 128], strides = [1, 1, 1]} : vector<8x8x128xf32> to vector<1x8x128xf32>
    %109 = vector.shape_cast %108 : vector<1x8x128xf32> to vector<8x128xf32>
    %110 = vector.shape_cast %109 : vector<8x128xf32> to vector<1x8x128xf32>
    %111 = vector.broadcast %107 : vector<8x1x128xf32> to vector<8x8x128xf32>
    %112 = vector.broadcast %110 : vector<1x8x128xf32> to vector<8x8x128xf32>
    %113 = arith.mulf %111, %112 : vector<8x8x128xf32>
    %114 = arith.addf %104, %113 : vector<8x8x128xf32>
    %115 = vector.extract_strided_slice %35 {offsets = [6, 0, 0], sizes = [1, 8, 128], strides = [1, 1, 1]} : vector<8x8x128xf32> to vector<1x8x128xf32>
    %116 = vector.shape_cast %115 : vector<1x8x128xf32> to vector<8x128xf32>
    %117 = vector.shape_cast %116 : vector<8x128xf32> to vector<8x1x128xf32>
    %118 = vector.extract_strided_slice %54 {offsets = [6, 0, 0], sizes = [1, 8, 128], strides = [1, 1, 1]} : vector<8x8x128xf32> to vector<1x8x128xf32>
    %119 = vector.shape_cast %118 : vector<1x8x128xf32> to vector<8x128xf32>
    %120 = vector.shape_cast %119 : vector<8x128xf32> to vector<1x8x128xf32>
    %121 = vector.broadcast %117 : vector<8x1x128xf32> to vector<8x8x128xf32>
    %122 = vector.broadcast %120 : vector<1x8x128xf32> to vector<8x8x128xf32>
    %123 = arith.mulf %121, %122 : vector<8x8x128xf32>
    %124 = arith.addf %114, %123 : vector<8x8x128xf32>
    %125 = vector.extract_strided_slice %35 {offsets = [7, 0, 0], sizes = [1, 8, 128], strides = [1, 1, 1]} : vector<8x8x128xf32> to vector<1x8x128xf32>
    %126 = vector.shape_cast %125 : vector<1x8x128xf32> to vector<8x128xf32>
    %127 = vector.shape_cast %126 : vector<8x128xf32> to vector<8x1x128xf32>
    %128 = vector.extract_strided_slice %54 {offsets = [7, 0, 0], sizes = [1, 8, 128], strides = [1, 1, 1]} : vector<8x8x128xf32> to vector<1x8x128xf32>
    %129 = vector.shape_cast %128 : vector<1x8x128xf32> to vector<8x128xf32>
    %130 = vector.shape_cast %129 : vector<8x128xf32> to vector<1x8x128xf32>
    %131 = vector.broadcast %127 : vector<8x1x128xf32> to vector<8x8x128xf32>
    %132 = vector.broadcast %130 : vector<1x8x128xf32> to vector<8x8x128xf32>
    %133 = arith.mulf %131, %132 : vector<8x8x128xf32>
    %134 = arith.addf %124, %133 : vector<8x8x128xf32>
    %135 = vector.shape_cast %40 : vector<8x128xf32> to vector<8x1x128xf32>
    %136 = vector.broadcast %135 : vector<8x1x128xf32> to vector<8x8x128xf32>
    %137 = arith.mulf %134, %136 : vector<8x8x128xf32>
    %cst_28 = arith.constant 0.000000e+00 : f32
    %138 = vector.broadcast %cst_28 : f32 to vector<8x8x128xf32>
    %139 = arith.subf %138, %137 : vector<8x8x128xf32>
    %140 = math.exp %139 : vector<8x8x128xf32>
    %cst_29 = arith.constant 1.000000e+00 : f32
    %141 = vector.broadcast %cst_29 : f32 to vector<8x8x128xf32>
    %142 = arith.addf %141, %140 : vector<8x8x128xf32>
    %143 = tpu.reciprocal %142 {approx = true} : vector<8x8x128xf32> -> vector<8x8x128xf32>
    %144 = vector.shape_cast %143 : vector<8x8x128xf32> to vector<64x128xf32>
    %c0_30 = arith.constant 0 : index
    %c0_31 = arith.constant 0 : index
    %145 = vector.load %arg9[%c0_30, %c0_31] : memref<64x128xf32, #tpu.memory_space<vmem>>, vector<64x128xf32>
    tpu.vector_store %arg9[%c0_30, %c0_31], %144 {strides = array<i32>} : memref<64x128xf32, #tpu.memory_space<vmem>>, vector<64x128xf32>,
    return
  }
  func.func @transform_0(%arg0: i32) -> (i32, i32, i32) {
    %c0_i32 = arith.constant 0 : i32
    %c0_i32_0 = arith.constant 0 : i32
    %c0_i32_1 = arith.constant 0 : i32
    return %c0_i32, %c0_i32_0, %arg0 : i32, i32, i32
  }
  func.func @transform_1(%arg0: i32) -> (i32, i32, i32) {
    %c0_i32 = arith.constant 0 : i32
    %c0_i32_0 = arith.constant 0 : i32
    %c0_i32_1 = arith.constant 0 : i32
    return %c0_i32, %c0_i32_0, %arg0 : i32, i32, i32
  }
  func.func @transform_2(%arg0: i32) -> (i32, i32) {
    %c0_i32 = arith.constant 0 : i32
    %c0_i32_0 = arith.constant 0 : i32
    return %c0_i32, %arg0 : i32, i32
  }
  func.func @transform_3(%arg0: i32) -> (i32, i32) {
    %c0_i32 = arith.constant 0 : i32
    %c0_i32_0 = arith.constant 0 : i32
    return %c0_i32, %arg0 : i32, i32
  }
  func.func @transform_4(%arg0: i32) -> (i32, i32, i32) {
    %c0_i32 = arith.constant 0 : i32
    %c0_i32_0 = arith.constant 0 : i32
    %c0_i32_1 = arith.constant 0 : i32
    return %c0_i32, %c0_i32_0, %arg0 : i32, i32, i32
  }
  func.func @transform_5(%arg0: i32) -> (i32, i32, i32) {
    %c0_i32 = arith.constant 0 : i32
    %c0_i32_0 = arith.constant 0 : i32
    %c0_i32_1 = arith.constant 0 : i32
    return %c0_i32, %c0_i32_0, %arg0 : i32, i32, i32
  }
  func.func @transform_6(%arg0: i32) -> (i32, i32) {
    %c0_i32 = arith.constant 0 : i32
    %c0_i32_0 = arith.constant 0 : i32
    %c0_i32_1 = arith.constant 0 : i32
    return %c0_i32, %c0_i32_0 : i32, i32
  }
  func.func @transform_7(%arg0: i32) -> (i32, i32) {
    %c0_i32 = arith.constant 0 : i32
    %c0_i32_0 = arith.constant 0 : i32
    %c0_i32_1 = arith.constant 0 : i32
    return %c0_i32, %c0_i32_0 : i32, i32
  }
  func.func @transform_8(%arg0: i32) -> (i32, i32) {
    %c0_i32 = arith.constant 0 : i32
    %c0_i32_0 = arith.constant 0 : i32
    return %c0_i32, %arg0 : i32, i32
  }
}

</mosaic_0001>

<bundles_post_ra>
// kernel: tpu_custom_call.1
= control target key start
LH: loop header
LB: loop body
LE: loop exit
PB: predicated region body
PF: predicated region fallthrough
CT: control target
= control target key end

     0   :  { %14 = vsyncpa [#allocation4], 0  ;;  %s2534_s0 = inlined_call_operand.hbm [shape: f32[8,8,128], index: 0, kind: input, shape index: {}]   ;;  %s2535_s1 = inlined_call_operand.hbm [shape: f32[8,8,128], index: 1, kind: input, shape index: {}]   ;;  %s2536_s2 = inlined_call_operand.vmem [shape: f32[8,128], index: 2, kind: input, shape index: {}]   ;;  %s2537_s3 = inlined_call_operand.vmem [shape: f32[8,128], index: 3, kind: input, shape index: {}]   ;;  %s2538_s4 = inlined_call_operand.hbm [shape: f32[8,8,128], index: 4, kind: input, shape index: {}]   ;;  %s2539_s5 = inlined_call_operand.hbm [shape: f32[8,8,128], index: 5, kind: input, shape index: {}]   ;;  %s2540_s6 = inlined_call_operand.vmem [shape: f32[8,1], index: 6, kind: input, shape index: {}]   ;;  %s2541_s7 = inlined_call_operand.<no memory space> [shape: f32[1,1], index: 7, kind: input, shape index: {}]   ;;  %s2542_s8 = inlined_call_operand.hbm [shape: f32[64,128], index: 8, kind: output, shape index: {}]  }
   0x1   :  { %15 = vsyncpa [#allocation7], 0 }
   0x2   :  { %16 = vsyncpa [#allocation10], 0 }
   0x3   :  { %17 = vsyncpa [#allocation5], 0  ;;  %s1751_s27 = smov [#allocation6]   ;;  %s1752_s29 = smov [#allocation3]  }
   0x4   :  { %s35_s28 = sshll.u32 %s1751_s27, 4  ;;  %s23_s30 = sshll.u32 %s1752_s29, 4  ;;  %s36_s28 = int_to_ptr.vmem [resolvable:$true] %s35_s28  ;;  %s1805_s30 = int_to_ptr.vmem [resolvable:$true] %s23_s30 }
   0x5   :  { %s1633_s11 = scalar_lea.hbm %s2535_s1, 1024 }
   0x6   :  { %p1634_p0 = scmp.ne.s32.totalorder %s2535_s1, %s1633_s11  ;;  %p1637_p1 = scmp.lt.u32.totalorder %s1633_s11, %s2535_s1 }
   0x8   :  { %p1639_p2 = pnand %p1637_p1, %p1634_p0 }
   0xa   :  { %1642 = shalt.err (!%p1639_p2)
}
   0xb   :  { %s1643_s16 = scalar_lea.vmem %s36_s28, 1024  ;;  %p1648_p4 = scmp.lt.s32.totalorder %s36_s28, %s36_s28 }
   0xc   :  { %p1644_p3 = scmp.ne.s32.totalorder %s36_s28, %s1643_s16  ;;  %p1649_p5 = scmp.lt.s32.totalorder %s1643_s16, %s1643_s16 }
   0xe   :  { %p1650_p6 = por %p1649_p5, %p1648_p4 }
  0x10   :  { %p1651_p7 = pnand %p1650_p6, %p1644_p3 }
  0x12   :  { %1654 = shalt.err (!%p1651_p7)
}
  0x13   :  { %s1753_s17 = smov 128   ;;  %s1754_s18 = smov 8  }
  0x14   :  { %41 = dma.hbm_to_vmem [thread:$0]  %s2535_s1, 1024, %s36_s28, [#allocation7], %s1753_s17, %s1753_s17, %s1754_s18  }
  0x15   :  { %s1655_s23 = scalar_lea.hbm %s2534_s0, 1024 }
  0x16   :  { %p1656_p8 = scmp.ne.s32.totalorder %s2534_s0, %s1655_s23  ;;  %p1659_p9 = scmp.lt.u32.totalorder %s1655_s23, %s2534_s0 }
  0x18   :  { %p1661_p10 = pnand %p1659_p9, %p1656_p8 }
  0x1a   :  { %1664 = shalt.err (!%p1661_p10)
}
  0x1b   :  { %s1665_s29 = scalar_lea.vmem %s1805_s30, 1024  ;;  %p1670_p12 = scmp.lt.s32.totalorder %s1805_s30, %s1805_s30 }
  0x1c   :  { %p1666_p11 = scmp.ne.s32.totalorder %s1805_s30, %s1665_s29  ;;  %p1671_p13 = scmp.lt.s32.totalorder %s1665_s29, %s1665_s29 }
  0x1e   :  { %p1672_p0 = por %p1671_p13, %p1670_p12 }
  0x20   :  { %p1673_p1 = pnand %p1672_p0, %p1666_p11 }
  0x22   :  { %1676 = shalt.err (!%p1673_p1)
}
  0x23   :  { %29 = dma.hbm_to_vmem [thread:$0]  %s2534_s0, 1024, %s1805_s30, [#allocation4], %s1753_s17, %s1753_s17, %s1754_s18  }
  0x24   :  { %s1755_s9 = smov [#allocation8]   ;;  %s1756_s11 = smov [#allocation9]  }
  0x25   :  { %s51_s10 = sshll.u32 %s1755_s9, 4  ;;  %s63_s12 = sshll.u32 %s1756_s11, 4  ;;  %s52_s10 = int_to_ptr.vmem [resolvable:$true] %s51_s10  ;;  %s1842_s12 = int_to_ptr.vmem [resolvable:$true] %s63_s12 }
  0x26   :  { %s1677_s15 = scalar_lea.hbm %s2538_s4, 1024 }
  0x27   :  { %p1678_p2 = scmp.ne.s32.totalorder %s2538_s4, %s1677_s15  ;;  %p1681_p3 = scmp.lt.u32.totalorder %s1677_s15, %s2538_s4 }
  0x29   :  { %p1683_p4 = pnand %p1681_p3, %p1678_p2 }
  0x2b   :  { %1686 = shalt.err (!%p1683_p4)
}
  0x2c   :  { %s1687_s0 = scalar_lea.vmem %s52_s10, 1024  ;;  %p1692_p6 = scmp.lt.s32.totalorder %s52_s10, %s52_s10 }
  0x2d   :  { %p1688_p5 = scmp.ne.s32.totalorder %s52_s10, %s1687_s0  ;;  %p1693_p7 = scmp.lt.s32.totalorder %s1687_s0, %s1687_s0 }
  0x2f   :  { %p1694_p8 = por %p1693_p7, %p1692_p6 }
  0x31   :  { %p1695_p9 = pnand %p1694_p8, %p1688_p5 }
  0x33   :  { %1698 = shalt.err (!%p1695_p9)
}
  0x34   :  { %57 = dma.hbm_to_vmem [thread:$0]  %s2538_s4, 1024, %s52_s10, [#allocation7], %s1753_s17, %s1753_s17, %s1754_s18  }
  0x35   :  { %s1699_s25 = scalar_lea.hbm %s2539_s5, 1024 }
  0x36   :  { %p1700_p10 = scmp.ne.s32.totalorder %s2539_s5, %s1699_s25  ;;  %p1703_p11 = scmp.lt.u32.totalorder %s1699_s25, %s2539_s5 }
  0x38   :  { %p1705_p12 = pnand %p1703_p11, %p1700_p10 }
  0x3a   :  { %1708 = shalt.err (!%p1705_p12)
}
  0x3b   :  { %s1709_s28 = scalar_lea.vmem %s1842_s12, 1024  ;;  %p1714_p0 = scmp.lt.s32.totalorder %s1842_s12, %s1842_s12 }
  0x3c   :  { %p1710_p13 = scmp.ne.s32.totalorder %s1842_s12, %s1709_s28  ;;  %p1715_p1 = scmp.lt.s32.totalorder %s1709_s28, %s1709_s28 }
  0x3e   :  { %p1716_p2 = por %p1715_p1, %p1714_p0 }
  0x40   :  { %p1717_p3 = pnand %p1716_p2, %p1710_p13 }
  0x42   :  { %1720 = shalt.err (!%p1717_p3)
}
  0x43   :  { %69 = dma.hbm_to_vmem [thread:$0]  %s2539_s5, 1024, %s1842_s12, [#allocation10], %s1753_s17, %s1753_s17, %s1754_s18  }
  0x44   :  { %1743 = dma.done.wait [#allocation4], 1024  }
  0x45   :  { %1744 = vsyncadd [#allocation4], 4294966272 }
  0x46   :  { %1745 = dma.done.wait [#allocation7], 2048  }
  0x47   :  { %1746 = vsyncadd [#allocation7], 4294965248 }
  0x48   :  { %1747 = dma.done.wait [#allocation10], 1024  }
  0x49   :  { %1748 = vsyncadd [#allocation10], 4294966272  ;;  %v1757_v0 = vmov 0   ;;  %v1758_v1 = vmov 1966171168   ;;  %v110_v3 = vlaneseq  ;;  %v381_v6 = vld [vmem:[%s2540_s6] sm:$0xff]  ;;  %v211_v11 = vstv %s2541_s7 }
  0x4a   :  { %1579 = vset.pattern.permute.xlu0 %v1757_v0  ;;  %v108_v2 = vunpack.c.l.s4 %v1758_v1  ;;  %v1884_v8 = vld [vmem:[#allocation6] sm:$0xff]  ;;  %v1886_v9 = vld [vmem:[#allocation6 + $0x8] sm:$0xff]  ;;  %v1894_v12 = vld [vmem:[#allocation6 + $0x10] sm:$0xff] }
  0x4b   :  { %v111_v5 = vshrl.u32 %v110_v3, 7  ;;  %424 = vperm.xlu0 %1579, %v381_v6   ;;  %v102_v10 = vld [vmem:[%s2536_s2] sm:$0xff]  ;;  %v1896_v13 = vld [vmem:[#allocation6 + $0x18] sm:$0xff]  ;;  %v1903_v18 = vld [vmem:[#allocation6 + $0x28] sm:$0xff]  ;;  %v212_v24 = vmul.f32 %v211_v11, %v1884_v8  ;;  %v213_v25 = vmul.f32 %v211_v11, %v1886_v9  ;;  %v214_v26 = vmul.f32 %v211_v11, %v1894_v12 }
  0x4c   :  { %v109_v4 = vunpack.c.0.s8 %v108_v2  ;;  %v1898_v14 = vld [vmem:[#allocation6 + $0x20] sm:$0xff]  ;;  %v106_v15 = vcombine.high %v102_v10, %v102_v10  ;;  %v1905_v19 = vld [vmem:[#allocation6 + $0x30] sm:$0xff]  ;;  %v1907_v20 = vld [vmem:[#allocation6 + $0x38] sm:$0xff]  ;;  %v215_v27 = vmul.f32 %v211_v11, %v1896_v13  ;;  %v217_v35 = vmul.f32 %v211_v11, %v1903_v18 }
  0x4d   :  { %v1901_v17 = vsub.s32 0, %v111_v5  ;;  %v216_v28 = vmul.f32 %v211_v11, %v1898_v14  ;;  %v103_v29 = vld [vmem:[%s2537_s3] sm:$0xff]  ;;  %v218_v36 = vmul.f32 %v211_v11, %v1905_v19  ;;  %v219_v37 = vmul.f32 %v211_v11, %v1907_v20  ;;  %v1933_v47 = vld [vmem:[#allocation3 + $0x8] sm:$0xff]  ;;  %v1935_v48 = vld [vmem:[#allocation3 + $0x10] sm:$0xff]  ;;  %s1759_s3 = smov [#allocation11]  }
  0x4e   :  { %v1882_v7 = vsub.s32 %v109_v4, %v111_v5  ;;  %v1925_v38 = vld [vmem:[#allocation3] sm:$0xff]  ;;  %v1931_v46 = vmul.f32 2.0, %v103_v29  ;;  %v1942_v54 = vld [vmem:[#allocation3 + $0x18] sm:$0xff]  ;;  %v1944_v55 = vld [vmem:[#allocation3 + $0x28] sm:$0xff]  ;;  %vm257_vm1 = vcmp.gt.f32.partialorder %v1933_v47, 0.5  ;;  %vm258_vm2 = vcmp.gt.f32.partialorder %v1935_v48, 0.5 }
  0x4f   :  { %v1937_v49 = vld [vmem:[#allocation3 + $0x20] sm:$0xff]  ;;  %v1946_v56 = vld [vmem:[#allocation3 + $0x30] sm:$0xff]  ;;  %vm256_vm0 = vcmp.gt.f32.partialorder %v1925_v38, 0.5  ;;  %v93_v1 = vld [vmem:[#allocation3 + $0x38] sm:$0xff]  ;;  %vm259_vm3 = vcmp.gt.f32.partialorder %v1942_v54, 0.5  ;;  %vm261_vm5 = vcmp.gt.f32.partialorder %v1944_v55, 0.5 }
  0x50   :  { %2547 = vst [vmem:[#allocation16_spill] sm:$0xff] %v1882_v7  ;;  %v113_v16 = vrot.slane %v102_v10, %v1882_v7  ;;  %v120_v21 = vrot.slane %v106_v15, %v1882_v7  ;;  %vm260_vm4 = vcmp.gt.f32.partialorder %v1937_v49, 0.5  ;;  %vm262_vm6 = vcmp.gt.f32.partialorder %v1946_v56, 0.5  ;;  %s1556_s7 = sshll.u32 %s1759_s3, 4  ;;  %s1557_s7 = int_to_ptr.vmem [resolvable:$true] %s1556_s7 }
  0x51   :  { %vm263_vm7 = vcmp.gt.f32.partialorder %v93_v1, 0.5  ;;  %s1721_s15 = scalar_lea.vmem %s1557_s7, 1024  ;;  %p1726_p5 = scmp.lt.s32.totalorder %s1557_s7, %s1557_s7 }
  0x52   :  { %v121_v22 = vcombine.high %v113_v16, %v113_v16  ;;  %v129_v23 = vrot.slane %v113_v16, %v1882_v7  ;;  %v122_v30 = vcombine.high %v120_v21, %v120_v21  ;;  %v136_v31 = vrot.slane %v120_v21, %v1882_v7  ;;  %p1722_p4 = scmp.ne.s32.totalorder %s1557_s7, %s1721_s15  ;;  %p1727_p6 = scmp.lt.s32.totalorder %s1721_s15, %s1721_s15 }
  0x54   :  { %v143_v32 = vrot.slane %v121_v22, %v1882_v7  ;;  %v151_v33 = vcombine.high %v129_v23, %v129_v23  ;;  %v158_v34 = vrot.slane %v129_v23, %v1901_v17  ;;  %v150_v39 = vrot.slane %v122_v30, %v1882_v7  ;;  %p1728_p7 = por %p1727_p6, %p1726_p5 }
  0x55   :  { %v152_v40 = vcombine.high %v136_v31, %v136_v31  ;;  %v174_v44 = vrot.slane %v136_v31, %v1901_v17 }
  0x56   :  { %v153_v41 = vcombine.high %v143_v32, %v143_v32  ;;  %v162_v42 = vrot.slane %v143_v32, %v1901_v17  ;;  %v166_v43 = vrot.slane %v151_v33, %v1901_v17  ;;  %v195_v45 = vadd.f32 %v158_v34, %v103_v29  ;;  %p1729_p8 = pnand %p1728_p7, %p1722_p4 }
  0x57   :  { %v154_v50 = vcombine.high %v150_v39, %v150_v39  ;;  %v178_v52 = vrot.slane %v150_v39, %v1901_v17  ;;  %v182_v53 = vrot.slane %v152_v40, %v1901_v17  ;;  %v199_v59 = vadd.f32 %v174_v44, %v103_v29 }
  0x58   :  { %v170_v51 = vrot.slane %v153_v41, %v1901_v17  ;;  %v196_v57 = vadd.f32 %v162_v42, %v103_v29  ;;  %v197_v58 = vadd.f32 %v166_v43, %v103_v29  ;;  %v203_v60 = vmul.f32 %v195_v45, %v1925_v38 }
  0x59   :  { %v186_v61 = vrot.slane %v154_v50, %v1901_v17  ;;  %v200_v63 = vadd.f32 %v178_v52, %v103_v29  ;;  %v201_v0 = vadd.f32 %v182_v53, %v103_v29  ;;  %v207_v4 = vmul.f32 %v199_v59, %v1937_v49 }
  0x5a   :  { %v198_v62 = vadd.f32 %v170_v51, %v103_v29  ;;  %v204_v2 = vmul.f32 %v196_v57, %v1933_v47  ;;  %v205_v3 = vmul.f32 %v197_v58, %v1935_v48  ;;  %v220_v5 = vadd.f32 %v212_v24, %v203_v60 }
  0x5b   :  { %v202_v6 = vadd.f32 %v186_v61, %v103_v29  ;;  %v208_v11 = vmul.f32 %v200_v63, %v1944_v55  ;;  %v209_v15 = vmul.f32 %v201_v0, %v1946_v56  ;;  %v224_v22 = vadd.f32 %v216_v28, %v207_v4 }
  0x5c   :  { %v206_v10 = vmul.f32 %v198_v62, %v1942_v54  ;;  %v221_v16 = vadd.f32 %v213_v25, %v204_v2  ;;  %v222_v21 = vadd.f32 %v214_v26, %v205_v3  ;;  %vm228_vm8 = vcmp.ge.f32.partialorder %v220_v5, 0.0 }
  0x5d   :  { %v210_v23 = vmul.f32 %v202_v6, %v93_v1  ;;  %v225_v30 = vadd.f32 %v217_v35, %v208_v11  ;;  %v226_v31 = vadd.f32 %v218_v36, %v209_v15  ;;  %v236_v29 = vmul.f32 0.2, %v220_v5 }
  0x5e   :  { %v223_v24 = vadd.f32 %v215_v27, %v206_v10  ;;  %vm229_vm9 = vcmp.ge.f32.partialorder %v221_v16, 0.0  ;;  %vm230_vm10 = vcmp.ge.f32.partialorder %v222_v21, 0.0  ;;  %v254_v32 = vmul.f32 0.2, %v1931_v46 }
  0x5f   :  { %v227_v33 = vadd.f32 %v219_v37, %v210_v23  ;;  %vm232_vm12 = vcmp.ge.f32.partialorder %v224_v22, 0.0  ;;  %vm233_vm13 = vcmp.ge.f32.partialorder %v225_v30, 0.0  ;;  %v237_v34 = vmul.f32 0.2, %v221_v16 }
  0x60   :  { %vm231_vm11 = vcmp.ge.f32.partialorder %v223_v24, 0.0  ;;  %v238_v39 = vmul.f32 0.2, %v222_v21  ;;  %v239_v40 = vmul.f32 0.2, %v223_v24  ;;  %v244_v25 = vsel %vm228_vm8, %v220_v5, %v236_v29 }
  0x61   :  { %vm234_vm14 = vcmp.ge.f32.partialorder %v226_v31, 0.0  ;;  %vm235_vm15 = vcmp.ge.f32.partialorder %v227_v33, 0.0  ;;  %v240_v26 = vmul.f32 0.2, %v224_v22  ;;  %v241_v27 = vmul.f32 0.2, %v225_v30 }
  0x62   :  { %v242_v28 = vmul.f32 0.2, %v226_v31  ;;  %v243_v35 = vmul.f32 0.2, %v227_v33  ;;  %v245_v36 = vsel %vm229_vm9, %v221_v16, %v237_v34  ;;  %v246_v41 = vsel %vm230_vm10, %v222_v21, %v238_v39 }
  0x63   :  { %v247_v42 = vsel %vm231_vm11, %v223_v24, %v239_v40  ;;  %v248_v37 = vsel %vm232_vm12, %v224_v22, %v240_v26  ;;  %v249_v43 = vsel %vm233_vm13, %v225_v30, %v241_v27  ;;  %v264_v44 = vsel %vm256_vm0, %v244_v25, -1e+30 }
  0x64   :  { %v250_v45 = vsel %vm234_vm14, %v226_v31, %v242_v28  ;;  %v251_v50 = vsel %vm235_vm15, %v227_v33, %v243_v35  ;;  %v265_v51 = vsel %vm257_vm1, %v245_v36, -1e+30  ;;  %v266_v52 = vsel %vm258_vm2, %v246_v41, -1e+30 }
  0x65   :  { %v267_v53 = vsel %vm259_vm3, %v247_v42, -1e+30  ;;  %v268_v57 = vsel %vm260_vm4, %v248_v37, -1e+30  ;;  %v269_v58 = vsel %vm261_vm5, %v249_v43, -1e+30 }
  0x66   :  { %v270_v38 = vsel %vm262_vm6, %v250_v45, -1e+30  ;;  %v271_v59 = vsel %vm263_vm7, %v251_v50, -1e+30  ;;  %v272_v60 = vmax.f32 %v264_v44, %v268_v57  ;;  %v273_v47 = vmax.f32 %v265_v51, %v269_v58 }
  0x67   :  { %vm253_vm0 = vcmp.ge.f32.partialorder %v1931_v46, 0.0  ;;  %v274_v48 = vmax.f32 %v266_v52, %v270_v38  ;;  %v275_v61 = vmax.f32 %v267_v53, %v271_v59 }
  0x68   :  { %v276_v62 = vmax.f32 %v272_v60, %v273_v47  ;;  %v255_v63 = vsel %vm253_vm0, %v1931_v46, %v254_v32 }
  0x69   :  { %v277_v54 = vmax.f32 %v274_v48, %v275_v61 }
  0x6b   :  { %v278_v49 = vmax.f32 %v276_v62, %v277_v54 }
  0x6d   :  { %v279_v0 = vmax.f32 %v278_v49, %v255_v63 }
  0x6f   :  { %v280_v2 = vsub.f32 %v264_v44, %v279_v0  ;;  %v281_v55 = vsub.f32 %v265_v51, %v279_v0  ;;  %v282_v3 = vsub.f32 %v266_v52, %v279_v0  ;;  %v283_v4 = vsub.f32 %v267_v53, %v279_v0 }
  0x70   :  { %v284_v56 = vsub.f32 %v268_v57, %v279_v0  ;;  %v285_v5 = vsub.f32 %v269_v58, %v279_v0  ;;  %v286_v1 = vsub.f32 %v270_v38, %v279_v0  ;;  %v287_v15 = vsub.f32 %v271_v59, %v279_v0 }
  0x71   :  { %v288_v6 = vmul.f32 1.442695, %v280_v2  ;;  %v290_v10 = vmul.f32 1.442695, %v281_v55  ;;  %v292_v11 = vmul.f32 1.442695, %v282_v3  ;;  %v304_v22 = vsub.f32 %v255_v63, %v279_v0 }
  0x72   :  { %v294_v16 = vmul.f32 1.442695, %v283_v4  ;;  %v296_v21 = vmul.f32 1.442695, %v284_v56  ;;  %v298_v23 = vmul.f32 1.442695, %v285_v5 }
  0x73   :  { %1581 = vpow2.f32 %v288_v6  ;;  %v300_v46 = vmul.f32 1.442695, %v286_v1  ;;  %v302_v24 = vmul.f32 1.442695, %v287_v15  ;;  %v305_v30 = vmul.f32 1.442695, %v304_v22 }
  0x74   :  { %1583 = vpow2.f32 %v290_v10 }
  0x75   :  { %1585 = vpow2.f32 %v292_v11 }
  0x76   :  { %1587 = vpow2.f32 %v294_v16 }
  0x77   :  { %1589 = vpow2.f32 %v296_v21 }
  0x78   :  { %1591 = vpow2.f32 %v298_v23 }
  0x79   :  { %1593 = vpow2.f32 %v300_v46 }
  0x7a   :  { %1595 = vpow2.f32 %v302_v24 }
  0x7b   :  { %1597 = vpow2.f32 %v305_v30 }
  0x7d   :  { %v1582_v31 = vpop.eup %1581 }
  0x7e   :  { %v1584_v29 = vpop.eup %1583  ;;  %v316_v32 = vmul.f32 %v1582_v31, %v1884_v8  ;;  %v558_v33 = vcombine.high %v1582_v31, %v1582_v31  ;;  %v565_v34 = vrot.slane %v1582_v31, %v1882_v7 }
  0x7f   :  { %v1986_v39 = vpop.eup %1585  ;;  %v307_v40 = vadd.f32 %v1584_v29, %v1582_v31  ;;  %v317_v25 = vmul.f32 %v1584_v29, %v1886_v9  ;;  %v664_v26 = vcombine.high %v1584_v29, %v1584_v29  ;;  %v2011_v50 = vrot.slane %v1584_v29, %v1882_v7 }
  0x80   :  { %v1989_v27 = vpop.eup %1587  ;;  %v318_v28 = vmul.f32 %v1986_v39, %v1894_v12  ;;  %v572_v35 = vrot.slane %v558_v33, %v1882_v7  ;;  %v573_v36 = vcombine.high %v565_v34, %v565_v34  ;;  %v1995_v41 = vrot.slane %v565_v34, %v1882_v7 }
  0x81   :  { %v1997_v8 = vpop.eup %1589  ;;  %v308_v42 = vadd.f32 %v1986_v39, %v307_v40  ;;  %v319_v37 = vmul.f32 %v1989_v27, %v1896_v13  ;;  %v324_v9 = vadd.f32 %v317_v25, %v316_v32  ;;  %v2019_v57 = vrot.slane %v664_v26, %v1882_v7  ;;  %v435_v25 = vld [vmem:[#allocation9] sm:$0xff]  ;;  %v436_v26 = vld [vmem:[#allocation9 + $0x8] sm:$0xff] }
  0x82   :  { %v2002_v43 = vpop.eup %1591  ;;  %v574_v44 = vcombine.high %v572_v35, %v572_v35  ;;  %v2005_v45 = vrot.slane %v572_v35, %v1882_v7  ;;  %v2008_v12 = vrot.slane %v573_v36, %v1882_v7  ;;  %v320_v13 = vmul.f32 %v1997_v8, %v1898_v14  ;;  %v437_v36 = vld [vmem:[#allocation9 + $0x10] sm:$0xff] }
  0x83   :  { %v2013_v51 = vpop.eup %1593  ;;  %v309_v52 = vadd.f32 %v1989_v27, %v308_v42  ;;  %v325_v53 = vadd.f32 %v324_v9, %v318_v28  ;;  %v321_v38 = vmul.f32 %v2002_v43, %v1903_v18  ;;  %v603_v47 = vcombine.high %v1995_v41, %v1995_v41  ;;  %v438_v42 = vld [vmem:[#allocation9 + $0x18] sm:$0xff] }
  0x84   :  { %v2021_v58 = vpop.eup %1595  ;;  %v322_v59 = vmul.f32 %v2013_v51, %v1905_v19  ;;  %v2028_v60 = vrot.slane %v574_v44, %v1882_v7  ;;  %v604_v62 = vcombine.high %v2005_v45, %v2005_v45  ;;  %v605_v54 = vcombine.high %v2008_v12, %v2008_v12 }
  0x85   :  { %v1598_v48 = vpop.eup %1597  ;;  %v310_v14 = vadd.f32 %v1997_v8, %v309_v52  ;;  %v326_v61 = vadd.f32 %v325_v53, %v319_v37  ;;  %v323_v18 = vmul.f32 %v2021_v58, %v1907_v20  ;;  %v610_v49 = vrot.slane %v1995_v41, %v1901_v17  ;;  %v439_v53 = vld [vmem:[#allocation9 + $0x20] sm:$0xff] }
  0x86   :  { %v444_v19 = vcombine.high %v1598_v48, %v1598_v48  ;;  %v451_v63 = vrot.slane %v1598_v48, %v1882_v7  ;;  %v606_v55 = vcombine.high %v2028_v60, %v2028_v60  ;;  %v614_v3 = vrot.slane %v2008_v12, %v1901_v17 }
  0x87   :  { %v311_v0 = vadd.f32 %v2002_v43, %v310_v14  ;;  %v327_v2 = vadd.f32 %v326_v61, %v320_v13  ;;  %v618_v5 = vrot.slane %v603_v47, %v1901_v17  ;;  %v622_v10 = vrot.slane %v605_v54, %v1901_v17 }
  0x88   :  { %v458_v4 = vrot.slane %v444_v19, %v1882_v7  ;;  %v459_v56 = vcombine.high %v451_v63, %v451_v63  ;;  %v467_v20 = vrot.slane %v451_v63, %v1882_v7  ;;  %v626_v11 = vrot.slane %v2005_v45, %v1901_v17  ;;  %v442_v63 = vld [vmem:[#allocation9 + $0x38] sm:$0xff] }
  0x89   :  { %v312_v1 = vadd.f32 %v2013_v51, %v311_v0  ;;  %v328_v6 = vadd.f32 %v327_v2, %v321_v38  ;;  %v630_v30 = vrot.slane %v2028_v60, %v1901_v17  ;;  %v440_v38 = vld [vmem:[#allocation9 + $0x28] sm:$0xff]  ;;  %v634_v60 = vrot.slane %v604_v62, %v1901_v17  ;;  %v549_v2 = vld [vmem:[#allocation8] sm:$0xff] }
  0x8a   :  { %v460_v15 = vcombine.high %v458_v4, %v458_v4  ;;  %v474_v16 = vrot.slane %v458_v4, %v1882_v7  ;;  %v481_v21 = vrot.slane %v459_v56, %v1882_v7  ;;  %v489_v22 = vcombine.high %v467_v20, %v467_v20 }
  0x8b   :  { %v313_v23 = vadd.f32 %v2021_v58, %v312_v1  ;;  %v329_v46 = vadd.f32 %v328_v6, %v322_v59  ;;  %v496_v24 = vrot.slane %v467_v20, %v1901_v17  ;;  %v441_v59 = vld [vmem:[#allocation9 + $0x30] sm:$0xff]  ;;  %v638_v47 = vrot.slane %v606_v55, %v1901_v17 }
  0x8c   :  { %v488_v31 = vrot.slane %v460_v15, %v1882_v7  ;;  %v490_v29 = vcombine.high %v474_v16, %v474_v16  ;;  %v491_v32 = vcombine.high %v481_v21, %v481_v21  ;;  %v500_v33 = vrot.slane %v481_v21, %v1901_v17 }
  0x8d   :  { %v314_v34 = vadd.f32 %v1598_v48, %v313_v23  ;;  %v330_v40 = vadd.f32 %v329_v46, %v323_v18  ;;  %v504_v28 = vrot.slane %v489_v22, %v1901_v17  ;;  %v512_v35 = vrot.slane %v474_v16, %v1901_v17 }
  0x8e   :  { %v492_v37 = vcombine.high %v488_v31, %v488_v31  ;;  %v508_v9 = vrot.slane %v491_v32, %v1901_v17  ;;  %v516_v44 = vrot.slane %v488_v31, %v1901_v17  ;;  %v520_v12 = vrot.slane %v490_v29, %v1901_v17 }
  0x8f   :  { %v332_v52 = vcombine.high %v330_v40, %v330_v40  ;;  %v339_v13 = vrot.slane %v330_v40, %v1882_v7  ;;  %1599 = vrcp.f32 %v314_v34  ;;  %v2071_v14 = vmul.f32 %v496_v24, %v435_v25 }
  0x90   :  { %v524_v48 = vrot.slane %v492_v37, %v1901_v17  ;;  %v2073_v61 = vmul.f32 %v500_v33, %v436_v26  ;;  %v2079_v0 = vmul.f32 %v504_v28, %v437_v36  ;;  %v2081_v62 = vmul.f32 %v508_v9, %v438_v42 }
  0x91   :  { %v346_v54 = vrot.slane %v332_v52, %v1882_v7  ;;  %v347_v18 = vcombine.high %v339_v13, %v339_v13  ;;  %v2077_v19 = vrot.slane %v339_v13, %v1882_v7  ;;  %v2083_v55 = vmul.f32 %v512_v35, %v439_v53 }
  0x92   :  { %v2085_v4 = vmul.f32 %v516_v44, %v440_v38  ;;  %v2087_v56 = vmul.f32 %v520_v12, %v441_v59  ;;  %v2099_v21 = vmul.f32 %v524_v48, %v442_v63  ;;  %v2104_v22 = vmul.f32 %v610_v49, %v549_v2  ;;  %v550_v12 = vld [vmem:[#allocation8 + $0x8] sm:$0xff] }
  0x93   :  { %v348_v20 = vcombine.high %v346_v54, %v346_v54  ;;  %v2090_v1 = vrot.slane %v346_v54, %v1882_v7  ;;  %v2093_v6 = vrot.slane %v347_v18, %v1882_v7  ;;  %v377_v15 = vcombine.high %v2077_v19, %v2077_v19 }
  0x94   :  { %v2106_v23 = vmul.f32 %v614_v3, %v549_v2  ;;  %v2115_v29 = vmul.f32 %v618_v5, %v549_v2  ;;  %v2124_v3 = vmul.f32 %v622_v10, %v549_v2  ;;  %v2134_v5 = vmul.f32 %v626_v11, %v549_v2 }
  0x95   :  { %v2109_v46 = vrot.slane %v348_v20, %v1882_v7  ;;  %v378_v24 = vcombine.high %v2090_v1, %v2090_v1  ;;  %v379_v31 = vcombine.high %v2093_v6, %v2093_v6  ;;  %v2120_v41 = vrot.slane %v377_v15, %v1901_v17 }
  0x96   :  { %v2136_v40 = vmul.f32 %v630_v30, %v549_v2  ;;  %v679_v10 = vcombine.high %v2011_v50, %v2011_v50  ;;  %v680_v28 = vcombine.high %v2019_v57, %v2019_v57  ;;  %v2147_v35 = vmul.f32 %v634_v60, %v549_v2 }
  0x97   :  { %v380_v33 = vcombine.high %v2109_v46, %v2109_v46  ;;  %v2129_v34 = vrot.slane %v379_v31, %v1901_v17  ;;  %v2141_v26 = vrot.slane %v378_v24, %v1901_v17  ;;  %v2149_v36 = vmul.f32 %v638_v47, %v549_v2 }
  0x98   :  { %v687_v45 = vrot.slane %v2011_v50, %v1882_v7  ;;  %v694_v11 = vrot.slane %v2019_v57, %v1882_v7  ;;  %v701_v42 = vrot.slane %v679_v10, %v1882_v7  ;;  %v708_v37 = vrot.slane %v680_v28, %v1882_v7 }
  0x99   :  { %v2155_v30 = vpop.eup %1599  ;;  %v770_v9 = vcombine.high %v1986_v39, %v1986_v39  ;;  %v777_v44 = vrot.slane %v1986_v39, %v1882_v7  ;;  %v2168_v47 = vrot.slane %v380_v33, %v1901_v17  ;;  %v876_v54 = vcombine.high %v1989_v27, %v1989_v27 }
  0x9a   :  { %v709_v52 = vcombine.high %v687_v45, %v687_v45  ;;  %v710_v13 = vcombine.high %v694_v11, %v694_v11  ;;  %v716_v50 = vrot.slane %v687_v45, %v1901_v17  ;;  %v732_v53 = vrot.slane %v694_v11, %v1901_v17 }
  0x9b   :  { %v711_v57 = vcombine.high %v701_v42, %v701_v42  ;;  %v712_v38 = vcombine.high %v708_v37, %v708_v37  ;;  %v720_v59 = vrot.slane %v701_v42, %v1901_v17  ;;  %v736_v60 = vrot.slane %v708_v37, %v1901_v17 }
  0x9c   :  { %v724_v48 = vrot.slane %v709_v52, %v1901_v17  ;;  %v740_v39 = vrot.slane %v710_v13, %v1901_v17  ;;  %v2176_v2 = vmul.f32 %v716_v50, %v550_v12  ;;  %v2178_v20 = vmul.f32 %v732_v53, %v550_v12 }
  0x9d   :  { %v728_v18 = vrot.slane %v711_v57, %v1901_v17  ;;  %v744_v63 = vrot.slane %v712_v38, %v1901_v17  ;;  %v2180_v15 = vmul.f32 %v720_v59, %v550_v12  ;;  %v2182_v24 = vmul.f32 %v736_v60, %v550_v12  ;;  %v551_v38 = vld [vmem:[#allocation8 + $0x10] sm:$0xff] }
  0x9e   :  { %v784_v31 = vrot.slane %v770_v9, %v1882_v7  ;;  %v785_v33 = vcombine.high %v777_v44, %v777_v44  ;;  %v2185_v10 = vmul.f32 %v724_v48, %v550_v12  ;;  %v2187_v28 = vmul.f32 %v740_v39, %v550_v12 }
  0x9f   :  { %v793_v45 = vrot.slane %v777_v44, %v1882_v7  ;;  %v883_v11 = vrot.slane %v1989_v27, %v1882_v7  ;;  %v890_v13 = vrot.slane %v876_v54, %v1882_v7  ;;  %v2195_v50 = vmul.f32 %v728_v18, %v550_v12 }
  0xa0   :  { %v786_v42 = vcombine.high %v784_v31, %v784_v31  ;;  %v800_v37 = vrot.slane %v784_v31, %v1882_v7  ;;  %v807_v52 = vrot.slane %v785_v33, %v1882_v7  ;;  %v2203_v18 = vmul.f32 %v744_v63, %v550_v12 }
  0xa1   :  { %v815_v9 = vcombine.high %v793_v45, %v793_v45  ;;  %v822_v53 = vrot.slane %v793_v45, %v1901_v17  ;;  %v891_v57 = vcombine.high %v883_v11, %v883_v11  ;;  %v892_v31 = vcombine.high %v890_v13, %v890_v13 }
  0xa2   :  { %v814_v59 = vrot.slane %v786_v42, %v1882_v7  ;;  %v816_v44 = vcombine.high %v800_v37, %v800_v37  ;;  %v817_v60 = vcombine.high %v807_v52, %v807_v52  ;;  %v826_v27 = vrot.slane %v807_v52, %v1901_v17 }
  0xa3   :  { %v830_v48 = vrot.slane %v815_v9, %v1901_v17  ;;  %v838_v39 = vrot.slane %v800_v37, %v1901_v17  ;;  %v899_v54 = vrot.slane %v883_v11, %v1882_v7  ;;  %v2208_v49 = vmul.f32 %v822_v53, %v551_v38  ;;  %v552_v53 = vld [vmem:[#allocation8 + $0x18] sm:$0xff] }
  0xa4   :  { %v818_v33 = vcombine.high %v814_v59, %v814_v59  ;;  %v834_v45 = vrot.slane %v817_v60, %v1901_v17  ;;  %v842_v25 = vrot.slane %v814_v59, %v1901_v17  ;;  %v846_v42 = vrot.slane %v816_v44, %v1901_v17 }
  0xa5   :  { %v2210_v32 = vmul.f32 %v826_v27, %v551_v38  ;;  %v906_v52 = vrot.slane %v890_v13, %v1882_v7  ;;  %v2214_v9 = vmul.f32 %v830_v48, %v551_v38  ;;  %v2218_v12 = vmul.f32 %v838_v39, %v551_v38 }
  0xa6   :  { %v850_v37 = vrot.slane %v818_v33, %v1901_v17  ;;  %v2216_v11 = vmul.f32 %v834_v45, %v551_v38  ;;  %v913_v63 = vrot.slane %v891_v57, %v1882_v7  ;;  %v920_v59 = vrot.slane %v892_v31, %v1882_v7 }
  0xa7   :  { %2548 = vst [vmem:[#allocation17_spill] sm:$0xff] %v2210_v32  ;;  %2549 = vst [vmem:[#allocation18_spill] sm:$0xff] %v2214_v9  ;;  %v921_v60 = vcombine.high %v899_v54, %v899_v54  ;;  %v922_v44 = vcombine.high %v906_v52, %v906_v52  ;;  %v2222_v16 = vmul.f32 %v842_v25, %v551_v38 }
  0xa8   :  { %2550 = vst [vmem:[#allocation19_spill] sm:$0xff] %v2216_v11  ;;  %2551 = vst [vmem:[#allocation20_spill] sm:$0xff] %v2218_v12  ;;  %v928_v27 = vrot.slane %v899_v54, %v1901_v17  ;;  %v944_v13 = vrot.slane %v906_v52, %v1901_v17  ;;  %v982_v48 = vcombine.high %v1997_v8, %v1997_v8 }
  0xa9   :  { %2552 = vst [vmem:[#allocation21_spill] sm:$0xff] %v2222_v16  ;;  %v923_v33 = vcombine.high %v913_v63, %v913_v63  ;;  %v924_v45 = vcombine.high %v920_v59, %v920_v59  ;;  %v932_v39 = vrot.slane %v913_v63, %v1901_v17  ;;  %v936_v57 = vrot.slane %v921_v60, %v1901_v17 }
  0xaa   :  { %v2230_v12 = vmul.f32 %v846_v42, %v551_v38  ;;  %v2232_v31 = vmul.f32 %v850_v37, %v551_v38  ;;  %v948_v25 = vrot.slane %v920_v59, %v1901_v17  ;;  %v952_v16 = vrot.slane %v922_v44, %v1901_v17 }
  0xab   :  { %v940_v54 = vrot.slane %v923_v33, %v1901_v17  ;;  %v956_v52 = vrot.slane %v924_v45, %v1901_v17  ;;  %v2238_v11 = vmul.f32 %v928_v27, %v552_v53  ;;  %v2240_v9 = vmul.f32 %v944_v13, %v552_v53 }
  0xac   :  { %2553 = vst [vmem:[#allocation22_spill] sm:$0xff] %v2230_v12  ;;  %2554 = vst [vmem:[#allocation23_spill] sm:$0xff] %v2232_v31  ;;  %v2242_v32 = vmul.f32 %v932_v39, %v552_v53  ;;  %v2244_v63 = vmul.f32 %v936_v57, %v552_v53  ;;  %v989_v38 = vrot.slane %v1997_v8, %v1882_v7  ;;  %v554_v12 = vld [vmem:[#allocation8 + $0x28] sm:$0xff] }
  0xad   :  { %2555 = vst [vmem:[#allocation24_spill] sm:$0xff] %v2238_v11  ;;  %2556 = vst [vmem:[#allocation25_spill] sm:$0xff] %v2240_v9  ;;  %v996_v42 = vrot.slane %v982_v48, %v1882_v7  ;;  %v2249_v37 = vmul.f32 %v948_v25, %v552_v53  ;;  %v2251_v59 = vmul.f32 %v952_v16, %v552_v53 }
  0xae   :  { %2557 = vst [vmem:[#allocation26_spill] sm:$0xff] %v2242_v32  ;;  %2558 = vst [vmem:[#allocation27_spill] sm:$0xff] %v2244_v63  ;;  %v1088_v60 = vcombine.high %v2002_v43, %v2002_v43  ;;  %v1095_v44 = vrot.slane %v2002_v43, %v1882_v7  ;;  %v997_v27 = vcombine.high %v989_v38, %v989_v38  ;;  %v553_v43 = vld [vmem:[#allocation8 + $0x20] sm:$0xff] }
  0xaf   :  { %2559 = vst [vmem:[#allocation28_spill] sm:$0xff] %v2249_v37  ;;  %2560 = vst [vmem:[#allocation29_spill] sm:$0xff] %v2251_v59  ;;  %v998_v13 = vcombine.high %v996_v42, %v996_v42  ;;  %v1005_v33 = vrot.slane %v989_v38, %v1882_v7  ;;  %v1012_v45 = vrot.slane %v996_v42, %v1882_v7 }
  0xb0   :  { %v2259_v39 = vmul.f32 %v940_v54, %v552_v53  ;;  %v1102_v8 = vrot.slane %v1088_v60, %v1882_v7  ;;  %v1103_v48 = vcombine.high %v1095_v44, %v1095_v44  ;;  %v1111_v16 = vrot.slane %v1095_v44, %v1882_v7 }
  0xb1   :  { %v1019_v57 = vrot.slane %v997_v27, %v1882_v7  ;;  %v1026_v25 = vrot.slane %v998_v13, %v1882_v7  ;;  %v1027_v59 = vcombine.high %v1005_v33, %v1005_v33  ;;  %v1028_v37 = vcombine.high %v1012_v45, %v1012_v45 }
  0xb2   :  { %2561 = vst [vmem:[#allocation30_spill] sm:$0xff] %v2259_v39  ;;  %v1034_v9 = vrot.slane %v1005_v33, %v1901_v17  ;;  %v1050_v38 = vrot.slane %v1012_v45, %v1901_v17  ;;  %v1104_v63 = vcombine.high %v1102_v8, %v1102_v8  ;;  %v1118_v54 = vrot.slane %v1102_v8, %v1882_v7 }
  0xb3   :  { %v1029_v42 = vcombine.high %v1019_v57, %v1019_v57  ;;  %v1030_v39 = vcombine.high %v1026_v25, %v1026_v25  ;;  %v1038_v60 = vrot.slane %v1019_v57, %v1901_v17  ;;  %v1042_v44 = vrot.slane %v1027_v59, %v1901_v17 }
  0xb4   :  { %v2270_v32 = vmul.f32 %v956_v52, %v552_v53  ;;  %v1054_v27 = vrot.slane %v1026_v25, %v1901_v17  ;;  %v1058_v13 = vrot.slane %v1028_v37, %v1901_v17  ;;  %v1194_v33 = vcombine.high %v2013_v51, %v2013_v51 }
  0xb5   :  { %v1046_v45 = vrot.slane %v1029_v42, %v1901_v17  ;;  %v1062_v11 = vrot.slane %v1030_v39, %v1901_v17  ;;  %v2278_v8 = vmul.f32 %v1034_v9, %v553_v43  ;;  %v2280_v31 = vmul.f32 %v1050_v38, %v553_v43 }
  0xb6   :  { %2562 = vst [vmem:[#allocation31_spill] sm:$0xff] %v2270_v32  ;;  %v2282_v57 = vmul.f32 %v1038_v60, %v553_v43  ;;  %v2284_v59 = vmul.f32 %v1042_v44, %v553_v43  ;;  %v1125_v53 = vrot.slane %v1103_v48, %v1882_v7  ;;  %v1132_v52 = vrot.slane %v1104_v63, %v1882_v7 }
  0xb7   :  { %2563 = vst [vmem:[#allocation32_spill] sm:$0xff] %v2280_v31  ;;  %v2288_v37 = vmul.f32 %v1054_v27, %v553_v43  ;;  %v2290_v25 = vmul.f32 %v1058_v13, %v553_v43  ;;  %v1133_v32 = vcombine.high %v1111_v16, %v1111_v16  ;;  %v1134_v42 = vcombine.high %v1118_v54, %v1118_v54 }
  0xb8   :  { %2564 = vst [vmem:[#allocation33_spill] sm:$0xff] %v2284_v59  ;;  %v1135_v39 = vcombine.high %v1125_v53, %v1125_v53  ;;  %v1136_v9 = vcombine.high %v1132_v52, %v1132_v52  ;;  %v1140_v38 = vrot.slane %v1111_v16, %v1901_v17  ;;  %v1144_v60 = vrot.slane %v1125_v53, %v1901_v17 }
  0xb9   :  { %2565 = vst [vmem:[#allocation34_spill] sm:$0xff] %v2288_v37  ;;  %2566 = vst [vmem:[#allocation35_spill] sm:$0xff] %v2290_v25  ;;  %v1148_v44 = vrot.slane %v1133_v32, %v1901_v17  ;;  %v1156_v31 = vrot.slane %v1118_v54, %v1901_v17  ;;  %v1160_v48 = vrot.slane %v1132_v52, %v1901_v17 }
  0xba   :  { %v1164_v63 = vrot.slane %v1134_v42, %v1901_v17  ;;  %v2298_v27 = vmul.f32 %v1046_v45, %v553_v43  ;;  %v2300_v13 = vmul.f32 %v1062_v11, %v553_v43  ;;  %v1152_v25 = vrot.slane %v1135_v39, %v1901_v17 }
  0xbb   :  { %v1168_v37 = vrot.slane %v1136_v9, %v1901_v17  ;;  %v2304_v59 = vmul.f32 %v1140_v38, %v554_v12  ;;  %v2306_v16 = vmul.f32 %v1144_v60, %v554_v12  ;;  %v2308_v53 = vmul.f32 %v1148_v44, %v554_v12 }
  0xbc   :  { %v2310_v32 = vmul.f32 %v1156_v31, %v554_v12  ;;  %v2312_v54 = vmul.f32 %v1160_v48, %v554_v12  ;;  %v2314_v52 = vmul.f32 %v1164_v63, %v554_v12  ;;  %v1201_v11 = vrot.slane %v2013_v51, %v1882_v7 }
  0xbd   :  { %2567 = vst [vmem:[#allocation36_spill] sm:$0xff] %v2306_v16  ;;  %2568 = vst [vmem:[#allocation37_spill] sm:$0xff] %v2308_v53  ;;  %v1208_v43 = vrot.slane %v1194_v33, %v1882_v7  ;;  %v2319_v45 = vmul.f32 %v1152_v25, %v554_v12  ;;  %v2321_v42 = vmul.f32 %v1168_v37, %v554_v12 }
  0xbe   :  { %2569 = vst [vmem:[#allocation38_spill] sm:$0xff] %v2310_v32  ;;  %2570 = vst [vmem:[#allocation39_spill] sm:$0xff] %v2312_v54  ;;  %v1300_v39 = vcombine.high %v2021_v58, %v2021_v58  ;;  %v1307_v31 = vrot.slane %v2021_v58, %v1882_v7  ;;  %v1209_v9 = vcombine.high %v1201_v11, %v1201_v11 }
  0xbf   :  { %2571 = vst [vmem:[#allocation40_spill] sm:$0xff] %v2314_v52  ;;  %2572 = vst [vmem:[#allocation41_spill] sm:$0xff] %v2319_v45  ;;  %v1210_v38 = vcombine.high %v1208_v43, %v1208_v43  ;;  %v1217_v60 = vrot.slane %v1201_v11, %v1882_v7  ;;  %v1224_v44 = vrot.slane %v1208_v43, %v1882_v7 }
  0xc0   :  { %2573 = vst [vmem:[#allocation42_spill] sm:$0xff] %v2321_v42  ;;  %v1314_v51 = vrot.slane %v1300_v39, %v1882_v7  ;;  %v1315_v48 = vcombine.high %v1307_v31, %v1307_v31  ;;  %v2331_v33 = vrot.slane %v1307_v31, %v1882_v7  ;;  %v1406_v12 = vcombine.high %v2155_v30, %v2155_v30  ;;  %v555_v42 = vld [vmem:[#allocation8 + $0x30] sm:$0xff] }
  0xc1   :  { %v1231_v37 = vrot.slane %v1209_v9, %v1882_v7  ;;  %v1238_v25 = vrot.slane %v1210_v38, %v1882_v7  ;;  %v1239_v58 = vcombine.high %v1217_v60, %v1217_v60  ;;  %v1240_v63 = vcombine.high %v1224_v44, %v1224_v44 }
  0xc2   :  { %v1246_v11 = vrot.slane %v1217_v60, %v1901_v17  ;;  %v1262_v43 = vrot.slane %v1224_v44, %v1901_v17  ;;  %v1316_v52 = vcombine.high %v1314_v51, %v1314_v51  ;;  %v2340_v39 = vrot.slane %v1314_v51, %v1882_v7 }
  0xc3   :  { %v1241_v31 = vcombine.high %v1231_v37, %v1231_v37  ;;  %v1242_v54 = vcombine.high %v1238_v25, %v1238_v25  ;;  %v1250_v32 = vrot.slane %v1231_v37, %v1901_v17  ;;  %v1254_v45 = vrot.slane %v1239_v58, %v1901_v17 }
  0xc4   :  { %v1266_v9 = vrot.slane %v1238_v25, %v1901_v17  ;;  %v1270_v38 = vrot.slane %v1240_v63, %v1901_v17  ;;  %v2348_v53 = vrot.slane %v2155_v30, %v1882_v7  ;;  %v2351_v60 = vrot.slane %v1406_v12, %v1882_v7 }
  0xc5   :  { %v1258_v44 = vrot.slane %v1241_v31, %v1901_v17  ;;  %v1274_v51 = vrot.slane %v1242_v54, %v1901_v17  ;;  %v2355_v16 = vmul.f32 %v1246_v11, %v555_v42  ;;  %v2357_v37 = vmul.f32 %v1262_v43, %v555_v42 }
  0xc6   :  { %2574 = vst [vmem:[#allocation43_spill] sm:$0xff] %v2348_v53  ;;  %2575 = vst [vmem:[#allocation44_spill] sm:$0xff] %v2351_v60  ;;  %v2359_v58 = vmul.f32 %v1250_v32, %v555_v42  ;;  %v2361_v25 = vmul.f32 %v1254_v45, %v555_v42  ;;  %v2364_v63 = vrot.slane %v1315_v48, %v1882_v7 }
  0xc7   :  { %v2367_v30 = vrot.slane %v1316_v52, %v1882_v7  ;;  %v2369_v12 = vmul.f32 %v1266_v9, %v555_v42  ;;  %v2371_v60 = vmul.f32 %v1270_v38, %v555_v42  ;;  %v1345_v54 = vcombine.high %v2331_v33, %v2331_v33 }
  0xc8   :  { %v1346_v11 = vcombine.high %v2340_v39, %v2340_v39  ;;  %v2377_v32 = vmul.f32 %v1258_v44, %v555_v42  ;;  %v2379_v45 = vmul.f32 %v1274_v51, %v555_v42  ;;  %v1347_v48 = vcombine.high %v2364_v63, %v2364_v63 }
  0xc9   :  { %v1348_v52 = vcombine.high %v2367_v30, %v2367_v30  ;;  %v2390_v9 = vrot.slane %v1345_v54, %v1901_v17  ;;  %v2579_v54 = vrot.slane %v2077_v19, %v1901_v17  ;;  %v2580_v38 = vrot.slane %v2093_v6, %v1901_v17 }
  0xca   :  { %2576 = vst [vmem:[#allocation45_spill] sm:$0xff] %v2379_v45  ;;  %v425_v42 = vpop.permute.xlu0 %424  ;;  %v2395_v44 = vrot.slane %v1347_v48, %v1901_v17  ;;  %v2400_v7 = vrot.slane %v1346_v11, %v1901_v17  ;;  %v2581_v51 = vrot.slane %v2090_v1, %v1901_v17 }
  0xcb   :  { %v2403_v43 = vrot.slane %v1348_v52, %v1901_v17  ;;  %v427_v31 = vmul.f32 %v425_v42, %v2579_v54  ;;  %v428_v53 = vmul.f32 %v425_v42, %v2580_v38  ;;  %v429_v48 = vmul.f32 %v425_v42, %v2120_v41 }
  0xcc   :  { %2577 = vst [vmem:[#allocation46_spill] sm:$0xff] %v2400_v7  ;;  %v430_v45 = vmul.f32 %v425_v42, %v2129_v34  ;;  %v431_v11 = vmul.f32 %v425_v42, %v2581_v51  ;;  %v2582_v52 = vrot.slane %v2109_v46, %v1901_v17  ;;  %v433_v7 = vmul.f32 %v425_v42, %v2141_v26 }
  0xcd   :  { %2578 = vst [vmem:[#allocation47_spill] sm:$0xff] %v2403_v43  ;;  %v434_v19 = vmul.f32 %v425_v42, %v2168_v47  ;;  %v541_v54 = vadd.f32 %v2071_v14, %v427_v31  ;;  %v542_v6 = vadd.f32 %v2073_v61, %v428_v53  ;;  %v543_v41 = vadd.f32 %v2079_v0, %v429_v48  ;;  %v2584_v53 = vld [vmem:[#allocation18_spill] sm:$0xff]  ;;  %v2587_v31 = vld [vmem:[#allocation21_spill] sm:$0xff]  ;;  %v2589_v48 = vld [vmem:[#allocation23_spill] sm:$0xff] }
  0xce   :  { %v432_v43 = vmul.f32 %v425_v42, %v2582_v52  ;;  %v544_v34 = vadd.f32 %v2081_v62, %v430_v45  ;;  %v545_v38 = vadd.f32 %v2083_v55, %v431_v11  ;;  %v547_v51 = vadd.f32 %v2087_v56, %v433_v7  ;;  %v2585_v45 = vld [vmem:[#allocation19_spill] sm:$0xff]  ;;  %v2588_v42 = vld [vmem:[#allocation22_spill] sm:$0xff]  ;;  %v2590_v11 = vld [vmem:[#allocation24_spill] sm:$0xff] }
  0xcf   :  { %v548_v46 = vadd.f32 %v2099_v21, %v434_v19  ;;  %v655_v26 = vadd.f32 %v2104_v22, %v541_v54  ;;  %v656_v47 = vadd.f32 %v2106_v23, %v542_v6  ;;  %v657_v14 = vadd.f32 %v2115_v29, %v543_v41  ;;  %v2591_v52 = vld [vmem:[#allocation26_spill] sm:$0xff]  ;;  %v2592_v19 = vld [vmem:[#allocation27_spill] sm:$0xff]  ;;  %v2594_v41 = vld [vmem:[#allocation25_spill] sm:$0xff] }
  0xd0   :  { %v546_v1 = vadd.f32 %v2085_v4, %v432_v43  ;;  %v658_v61 = vadd.f32 %v2124_v3, %v544_v34  ;;  %v659_v0 = vadd.f32 %v2134_v5, %v545_v38  ;;  %v661_v55 = vadd.f32 %v2147_v35, %v547_v51  ;;  %v2583_v35 = vld [vmem:[#allocation17_spill] sm:$0xff]  ;;  %v2586_v43 = vld [vmem:[#allocation20_spill] sm:$0xff]  ;;  %v2593_v54 = vld [vmem:[#allocation30_spill] sm:$0xff] }
  0xd1   :  { %v662_v4 = vadd.f32 %v2149_v36, %v548_v46  ;;  %v761_v7 = vadd.f32 %v2176_v2, %v655_v26  ;;  %v762_v56 = vadd.f32 %v2180_v15, %v656_v47  ;;  %v763_v21 = vadd.f32 %v2185_v10, %v657_v14  ;;  %v2595_v38 = vld [vmem:[#allocation28_spill] sm:$0xff]  ;;  %v2596_v51 = vld [vmem:[#allocation29_spill] sm:$0xff]  ;;  %v2597_v26 = vld [vmem:[#allocation31_spill] sm:$0xff] }
  0xd2   :  { %v660_v62 = vadd.f32 %v2136_v40, %v546_v1  ;;  %v764_v22 = vadd.f32 %v2195_v50, %v658_v61  ;;  %v765_v23 = vadd.f32 %v2178_v20, %v659_v0  ;;  %v767_v3 = vadd.f32 %v2187_v28, %v661_v55  ;;  %v2598_v0 = vld [vmem:[#allocation33_spill] sm:$0xff] }
  0xd3   :  { %v768_v5 = vadd.f32 %v2203_v18, %v662_v4  ;;  %v867_v40 = vadd.f32 %v2208_v49, %v761_v7  ;;  %v868_v36 = vadd.f32 %v2583_v35, %v762_v56  ;;  %v869_v2 = vadd.f32 %v2584_v53, %v763_v21  ;;  %v556_v4 = vld [vmem:[#allocation8 + $0x38] sm:$0xff]  ;;  %v2599_v7 = vld [vmem:[#allocation32_spill] sm:$0xff]  ;;  %v2600_v21 = vld [vmem:[#allocation34_spill] sm:$0xff] }
  0xd4   :  { %v766_v29 = vadd.f32 %v2182_v24, %v660_v62  ;;  %v870_v15 = vadd.f32 %v2585_v45, %v764_v22  ;;  %v871_v10 = vadd.f32 %v2586_v43, %v765_v23  ;;  %v873_v20 = vadd.f32 %v2588_v42, %v767_v3  ;;  %v2601_v23 = vld [vmem:[#allocation35_spill] sm:$0xff]  ;;  %v2607_v43 = vld [vmem:[#allocation40_spill] sm:$0xff] }
  0xd5   :  { %v874_v24 = vadd.f32 %v2589_v48, %v768_v5  ;;  %v973_v28 = vadd.f32 %v2590_v11, %v867_v40  ;;  %v974_v18 = vadd.f32 %v2591_v52, %v868_v36  ;;  %v975_v49 = vadd.f32 %v2592_v19, %v869_v2  ;;  %v2602_v40 = vld [vmem:[#allocation36_spill] sm:$0xff]  ;;  %v2605_v2 = vld [vmem:[#allocation38_spill] sm:$0xff] }
  0xd6   :  { %v872_v50 = vadd.f32 %v2587_v31, %v766_v29  ;;  %v976_v6 = vadd.f32 %v2593_v54, %v870_v15  ;;  %v977_v34 = vadd.f32 %v2594_v41, %v871_v10  ;;  %v979_v46 = vadd.f32 %v2596_v51, %v873_v20  ;;  %v2608_v31 = vld [vmem:[#allocation42_spill] sm:$0xff]  ;;  %v2613_v54 = vld [vmem:[#allocation45_spill] sm:$0xff]  ;;  %v2615_v41 = vld [vmem:[#allocation47_spill] sm:$0xff] }
  0xd7   :  { %v980_v47 = vadd.f32 %v2597_v26, %v874_v24  ;;  %v1079_v14 = vadd.f32 %v2278_v8, %v973_v28  ;;  %v1080_v61 = vadd.f32 %v2282_v57, %v974_v18  ;;  %v1081_v62 = vadd.f32 %v2598_v0, %v975_v49  ;;  %v2603_v8 = vld [vmem:[#allocation37_spill] sm:$0xff]  ;;  %v2617_v51 = vld [vmem:[#allocation44_spill] sm:$0xff] }
  0xd8   :  { %v978_v1 = vadd.f32 %v2595_v38, %v872_v50  ;;  %v1082_v55 = vadd.f32 %v2298_v27, %v976_v6  ;;  %v1083_v56 = vadd.f32 %v2599_v7, %v977_v34  ;;  %v1085_v29 = vadd.f32 %v2601_v23, %v979_v46  ;;  %v2604_v57 = vld [vmem:[#allocation41_spill] sm:$0xff]  ;;  %v2606_v27 = vld [vmem:[#allocation39_spill] sm:$0xff]  ;;  %v2614_v6 = vld [vmem:[#allocation46_spill] sm:$0xff] }
  0xd9   :  { %v1086_v3 = vadd.f32 %v2300_v13, %v980_v47  ;;  %v1185_v5 = vadd.f32 %v2304_v59, %v1079_v14  ;;  %v1186_v35 = vadd.f32 %v2602_v40, %v1080_v61  ;;  %v1187_v36 = vadd.f32 %v2603_v8, %v1081_v62  ;;  %v2618_v47 = vld [vmem:[#allocation16_spill] sm:$0xff] }
  0xda   :  { %v1084_v22 = vadd.f32 %v2600_v21, %v978_v1  ;;  %v1188_v53 = vadd.f32 %v2604_v57, %v1082_v55  ;;  %v1189_v45 = vadd.f32 %v2605_v2, %v1083_v56  ;;  %v1191_v10 = vadd.f32 %v2607_v43, %v1085_v29  ;;  %v2616_v1 = vld [vmem:[#allocation43_spill] sm:$0xff] }
  0xdb   :  { %v1192_v50 = vadd.f32 %v2608_v31, %v1086_v3  ;;  %v1291_v42 = vadd.f32 %v2355_v16, %v1185_v5  ;;  %v1292_v13 = vadd.f32 %v2359_v58, %v1186_v35  ;;  %v2609_v59 = vrot.slane %v2331_v33, %v1901_v17 }
  0xdc   :  { %v1190_v15 = vadd.f32 %v2606_v27, %v1084_v22  ;;  %v2610_v48 = vrot.slane %v2364_v63, %v1901_v17  ;;  %v1293_v11 = vadd.f32 %v2361_v25, %v1187_v36  ;;  %v1294_v28 = vadd.f32 %v2377_v32, %v1188_v53 }
  0xdd   :  { %v1389_v20 = vmul.f32 %v2609_v59, %v556_v4  ;;  %v1295_v52 = vadd.f32 %v2357_v37, %v1189_v45  ;;  %v1391_v16 = vmul.f32 %v2390_v9, %v556_v4  ;;  %v1392_v58 = vmul.f32 %v2395_v44, %v556_v4 }
  0xde   :  { %v1390_v24 = vmul.f32 %v2610_v48, %v556_v4  ;;  %v1296_v18 = vadd.f32 %v2369_v12, %v1190_v15  ;;  %v2611_v33 = vrot.slane %v2340_v39, %v1901_v17  ;;  %v2612_v63 = vrot.slane %v2367_v30, %v1901_v17 }
  0xdf   :  { %v1297_v25 = vadd.f32 %v2371_v60, %v1191_v10  ;;  %v1298_v32 = vadd.f32 %v2613_v54, %v1192_v50  ;;  %v1395_v37 = vmul.f32 %v2614_v6, %v556_v4  ;;  %v1396_v12 = vmul.f32 %v2615_v41, %v556_v4 }
  0xe0   :  { %v1393_v19 = vmul.f32 %v2611_v33, %v556_v4  ;;  %v1394_v49 = vmul.f32 %v2612_v63, %v556_v4  ;;  %v1397_v34 = vadd.f32 %v1389_v20, %v1291_v42  ;;  %v1398_v9 = vadd.f32 %v1390_v24, %v1292_v13 }
  0xe1   :  { %v1399_v38 = vadd.f32 %v1391_v16, %v1293_v11  ;;  %v1400_v44 = vadd.f32 %v1392_v58, %v1294_v28  ;;  %v1421_v39 = vcombine.high %v2616_v1, %v2616_v1  ;;  %v1422_v46 = vcombine.high %v2617_v51, %v2617_v51 }
  0xe2   :  { %v1401_v30 = vadd.f32 %v1393_v19, %v1295_v52  ;;  %v1402_v26 = vadd.f32 %v1394_v49, %v1296_v18  ;;  %v1429_v60 = vrot.slane %v2616_v1, %v2618_v47  ;;  %v1436_v14 = vrot.slane %v2617_v51, %v2618_v47 }
  0xe3   :  { %v1403_v61 = vadd.f32 %v1395_v37, %v1297_v25  ;;  %v1404_v0 = vadd.f32 %v1396_v12, %v1298_v32  ;;  %v1443_v62 = vrot.slane %v1421_v39, %v2618_v47  ;;  %v1450_v55 = vrot.slane %v1422_v46, %v2618_v47 }
  0xe4   :  { %v1451_v4 = vcombine.high %v1429_v60, %v1429_v60  ;;  %v1452_v7 = vcombine.high %v1436_v14, %v1436_v14  ;;  %v1458_v56 = vrot.slane %v1429_v60, %v1901_v17  ;;  %v1474_v21 = vrot.slane %v1436_v14, %v1901_v17 }
  0xe5   :  { %v1453_v22 = vcombine.high %v1443_v62, %v1443_v62  ;;  %v1454_v23 = vcombine.high %v1450_v55, %v1450_v55  ;;  %v1462_v29 = vrot.slane %v1443_v62, %v1901_v17  ;;  %v1478_v3 = vrot.slane %v1450_v55, %v1901_v17 }
  0xe6   :  { %v1466_v5 = vrot.slane %v1451_v4, %v1901_v17  ;;  %v1482_v40 = vrot.slane %v1452_v7, %v1901_v17  ;;  %v1495_v35 = vmul.f32 %v1458_v56, %v1397_v34  ;;  %v1499_v8 = vmul.f32 %v1474_v21, %v1401_v30 }
  0xe7   :  { %v1470_v36 = vrot.slane %v1453_v22, %v1901_v17  ;;  %v1486_v57 = vrot.slane %v1454_v23, %v1901_v17  ;;  %v1496_v53 = vmul.f32 %v1462_v29, %v1398_v9  ;;  %v1500_v2 = vmul.f32 %v1478_v3, %v1402_v26 }
  0xe8   :  { %v1497_v45 = vmul.f32 %v1466_v5, %v1399_v38  ;;  %v1501_v27 = vmul.f32 %v1482_v40, %v1403_v61  ;;  %v1503_v15 = vsub.f32 0.0, %v1495_v35  ;;  %v1507_v43 = vsub.f32 0.0, %v1499_v8 }
  0xe9   :  { %v1498_v10 = vmul.f32 %v1470_v36, %v1400_v44  ;;  %v1502_v31 = vmul.f32 %v1486_v57, %v1404_v0  ;;  %v1504_v50 = vsub.f32 0.0, %v1496_v53  ;;  %v1508_v42 = vsub.f32 0.0, %v1500_v2 }
  0xea   :  { %v1505_v13 = vsub.f32 0.0, %v1497_v45  ;;  %v1509_v59 = vsub.f32 0.0, %v1501_v27  ;;  %v1511_v20 = vmul.f32 1.442695, %v1503_v15  ;;  %v1519_v52 = vmul.f32 1.442695, %v1507_v43 }
  0xeb   :  { %v1506_v48 = vsub.f32 0.0, %v1498_v10  ;;  %v1510_v24 = vsub.f32 0.0, %v1502_v31  ;;  %v1513_v11 = vmul.f32 1.442695, %v1504_v50  ;;  %v1521_v18 = vmul.f32 1.442695, %v1508_v42 }
  0xec   :  { %1601 = vpow2.f32 %v1511_v20  ;;  %v1515_v28 = vmul.f32 1.442695, %v1505_v13  ;;  %v1523_v16 = vmul.f32 1.442695, %v1509_v59 }
  0xed   :  { %1603 = vpow2.f32 %v1513_v11  ;;  %v1517_v17 = vmul.f32 1.442695, %v1506_v48  ;;  %v1525_v58 = vmul.f32 1.442695, %v1510_v24 }
  0xee   :  { %1605 = vpow2.f32 %v1515_v28 }
  0xef   :  { %1607 = vpow2.f32 %v1517_v17 }
  0xf0   :  { %1609 = vpow2.f32 %v1519_v52 }
  0xf1   :  { %1611 = vpow2.f32 %v1521_v18 }
  0xf2   :  { %1613 = vpow2.f32 %v1523_v16 }
  0xf3   :  { %1615 = vpow2.f32 %v1525_v58 }
  0xf6   :  { %v1602_v33 = vpop.eup %1601 }
  0xf7   :  { %v1604_v19 = vpop.eup %1603  ;;  %v1527_v63 = vadd.f32 1.0, %v1602_v33 }
  0xf8   :  { %v1606_v49 = vpop.eup %1605  ;;  %v1528_v25 = vadd.f32 1.0, %v1604_v19 }
  0xf9   :  { %v1608_v54 = vpop.eup %1607  ;;  %v1529_v32 = vadd.f32 1.0, %v1606_v49  ;;  %1617 = vrcp.f32 %v1527_v63 }
  0xfa   :  { %v1610_v6 = vpop.eup %1609  ;;  %v1530_v37 = vadd.f32 1.0, %v1608_v54  ;;  %1619 = vrcp.f32 %v1528_v25 }
  0xfb   :  { %v1612_v41 = vpop.eup %1611  ;;  %v1531_v12 = vadd.f32 1.0, %v1610_v6  ;;  %1621 = vrcp.f32 %v1529_v32 }
  0xfc   :  { %v1614_v34 = vpop.eup %1613  ;;  %v1532_v9 = vadd.f32 1.0, %v1612_v41  ;;  %1623 = vrcp.f32 %v1530_v37 }
  0xfd   :  { %v1616_v38 = vpop.eup %1615  ;;  %v1533_v44 = vadd.f32 1.0, %v1614_v34  ;;  %1625 = vrcp.f32 %v1531_v12 }
  0xfe   :  { %v1534_v1 = vadd.f32 1.0, %v1616_v38  ;;  %1627 = vrcp.f32 %v1532_v9 }
  0xff   :  { %1629 = vrcp.f32 %v1533_v44 }
 0x100   :  { %1631 = vrcp.f32 %v1534_v1 }
 0x103   :  { %v1618_v39 = vpop.eup %1617 }
 0x104   :  { %v1620_v51 = vpop.eup %1619  ;;  %1543 = vst [vmem:[#allocation11] sm:$0xff] %v1618_v39 }
 0x105   :  { %v1622_v46 = vpop.eup %1621  ;;  %1544 = vst [vmem:[#allocation11 + $0x8] sm:$0xff] %v1620_v51 }
 0x106   :  { %v1624_v30 = vpop.eup %1623  ;;  %1545 = vst [vmem:[#allocation11 + $0x10] sm:$0xff] %v1622_v46 }
 0x107   :  { %v1626_v26 = vpop.eup %1625  ;;  %1546 = vst [vmem:[#allocation11 + $0x18] sm:$0xff] %v1624_v30 }
 0x108   :  { %v1628_v47 = vpop.eup %1627  ;;  %1547 = vst [vmem:[#allocation11 + $0x20] sm:$0xff] %v1626_v26 }
 0x109   :  { %v1630_v60 = vpop.eup %1629  ;;  %1548 = vst [vmem:[#allocation11 + $0x28] sm:$0xff] %v1628_v47 }
 0x10a   :  { %v1632_v14 = vpop.eup %1631  ;;  %1549 = vst [vmem:[#allocation11 + $0x30] sm:$0xff] %v1630_v60 }
 0x10b   :  { %1550 = vst [vmem:[#allocation11 + $0x38] sm:$0xff] %v1632_v14 }
 0x10c   :  { %1732 = shalt.err (!%p1729_p8)
}
 0x10d   :  { %s1733_s20 = scalar_lea.hbm %s2542_s8, 1024 }
 0x10e   :  { %p1734_p9 = scmp.ne.s32.totalorder %s2542_s8, %s1733_s20  ;;  %p1737_p10 = scmp.lt.u32.totalorder %s1733_s20, %s2542_s8 }
 0x110   :  { %p1739_p11 = pnand %p1737_p10, %p1734_p9 }
 0x112   :  { %1742 = shalt.err (!%p1739_p11)
}
 0x113   :  { %1562 = dma.vmem_to_hbm [thread:$0]  %s1557_s7, 1024, %s2542_s8, [#allocation5], %s1753_s17, %s1753_s17, %s1754_s18  }
 0x114   :  { %1749 = dma.done.wait [#allocation5], 1024  }
 0x115   :  { %1750 = vsyncadd [#allocation5], 4294966272 }
 0x116   :  { %1566 = vsyncpa [#allocation4], 1 }
 0x117   :  { %1567 = vsyncpa [#allocation7], 1 }
 0x118   :  { %1568 = vsyncpa [#allocation10], 1 }
 0x119   :  { %1569 = vsyncpa [#allocation5], 1 }

</bundles_post_ra>
